<compile_context>
chip_gen: v7x
topology: tpu7x:2x2x1
jax: 0.10.0
libtpu: 0.0.40
codegen_flags: <defaults>
</compile_context>

<pallas_src>
import jax
import jax.numpy as jnp
import numpy as np
from jax.experimental import pallas as pl
from jax.experimental.pallas import tpu as pltpu

FEATURE_DIM = 1280   # EfficientNet-B0 feature channels
HIDDEN_DIM = 512
EMBED_DIM = 128
_NORM_EPS = 1e-12    # F.normalize eps (clamp on the norm)


def _embed_head_kernel(x_ref, w1_ref, b1_ref, w2_ref, b2_ref, o_ref):
    # x_ref : [TM, 1280] bf16 pooled features (anchor/positive/negative rows merged)
    # w1_ref: [1280, 512] bf16     b1_ref: [1, 512] f32
    # w2_ref: [512, 128]  bf16     b2_ref: [1, 128] f32
    # o_ref : [TM, 128] f32
    # Linear(1280, 512) + ReLU   (bf16 MXU, f32 accumulate, f32 bias/ReLU)
    h = jnp.dot(x_ref[...], w1_ref[...], preferred_element_type=jnp.float32)
    h = jnp.maximum(h + b1_ref[...], 0.0)
    # Linear(512, 128)
    z = jnp.dot(h.astype(jnp.bfloat16), w2_ref[...],
                preferred_element_type=jnp.float32)
    z = z + b2_ref[...]
    # F.normalize(p=2, dim=1, eps=1e-12):
    #   z / max(||z||, eps) == z * rsqrt(max(||z||^2, eps^2))   (rsqrt -> EUP slot)
    ssq = jnp.sum(z * z, axis=-1, keepdims=True)
    o_ref[...] = z * jax.lax.rsqrt(jnp.maximum(ssq, _NORM_EPS * _NORM_EPS))


def _pooled_embed(pooled_bf16, params, *, block_m=256):
    """Fused embedding head on pooled features. pooled_bf16: [M, 1280] bf16."""
    w1, b1, w2, b2 = params
    M, C = pooled_bf16.shape
    assert C == FEATURE_DIM
    if M <= block_m:
        tm = M                                   # full-dim block (no (8,128) issue)
    else:
        tm = max(8, (block_m // 8) * 8)          # keep second-to-last block dim %8
    return pl.pallas_call(
        _embed_head_kernel,
        out_shape=jax.ShapeDtypeStruct((M, EMBED_DIM), jnp.float32),
        grid=(pl.cdiv(M, tm),),
        in_specs=[
            pl.BlockSpec((tm, FEATURE_DIM), lambda i: (i, 0)),
            pl.BlockSpec((FEATURE_DIM, HIDDEN_DIM), lambda i: (0, 0)),
            pl.BlockSpec((1, HIDDEN_DIM), lambda i: (0, 0)),
            pl.BlockSpec((HIDDEN_DIM, EMBED_DIM), lambda i: (0, 0)),
            pl.BlockSpec((1, EMBED_DIM), lambda i: (0, 0)),
        ],
        out_specs=pl.BlockSpec((tm, EMBED_DIM), lambda i: (i, 0)),
        compiler_params=pltpu.CompilerParams(
            dimension_semantics=("parallel",),
        ),
    )(pooled_bf16, w1, b1, w2, b2)


def triplet_forward(anchor, positive, negative, params, *, block_m=256):
    """anchor/positive/negative: [B, 1280, H, W] backbone feature maps (NCHW)."""
    B = anchor.shape[0]

    def pool(x):
        # AdaptiveAvgPool2d(1) + flatten as a single fused XLA reduce over the
        # trailing (contiguous) H,W dims: one HBM read pass, no transpose/stack.
        # Accumulate in f32 (inputs may be bf16).
        return jnp.mean(x.astype(jnp.float32), axis=(2, 3))        # [B, 1280] f32

    # Merge the three branches into the matmul M dimension (shared weights).
    pooled = jnp.concatenate([pool(anchor), pool(positive), pool(negative)], axis=0)
    pooled = pooled.astype(jnp.bfloat16)                           # bf16 MXU operands
    out = _pooled_embed(pooled, params, block_m=block_m)           # [3B, 128] f32
    return out[:B], out[B:2 * B], out[2 * B:]


def init_params(key):
    """Deterministic init (PyTorch Linear-style uniform); W1/W2 in bf16, biases f32."""
    k1, k2, k3, k4 = jax.random.split(key, 4)
    lim1 = 1.0 / np.sqrt(FEATURE_DIM)
    lim2 = 1.0 / np.sqrt(HIDDEN_DIM)
    w1 = jax.random.uniform(k1, (FEATURE_DIM, HIDDEN_DIM), jnp.float32,
                            -lim1, lim1).astype(jnp.bfloat16)
    b1 = jax.random.uniform(k2, (1, HIDDEN_DIM), jnp.float32, -lim1, lim1)
    w2 = jax.random.uniform(k3, (HIDDEN_DIM, EMBED_DIM), jnp.float32,
                            -lim2, lim2).astype(jnp.bfloat16)
    b2 = jax.random.uniform(k4, (1, EMBED_DIM), jnp.float32, -lim2, lim2)
    return w1, b1, w2, b2


def _reference_forward_one(x_nchw, params):
    """Plain-JAX reference of the same head with matching numerics (bf16 matmul operands)."""
    w1, b1, w2, b2 = params
    pooled = jnp.mean(x_nchw.astype(jnp.float32), axis=(2, 3))     # [B, 1280]
    p_bf = pooled.astype(jnp.bfloat16).astype(jnp.float32)
    h = jnp.maximum(p_bf @ w1.astype(jnp.float32) + b1, 0.0)
    z = h.astype(jnp.bfloat16).astype(jnp.float32) @ w2.astype(jnp.float32) + b2
    nrm = jnp.sqrt(jnp.sum(z * z, axis=-1, keepdims=True))
    return z / jnp.maximum(nrm, _NORM_EPS)


if __name__ == "__main__":
    key = jax.random.PRNGKey(0)
    kp, ka, kpz, kn = jax.random.split(key, 4)
    params = init_params(kp)

    # Small shapes: batch=2, backbone feature maps 1280 x 4 x 4 (NCHW), bf16
    # (a TPU backbone would emit bf16 activations -> half the HBM bytes).
    B, H, W = 2, 4, 4
    anchor = jax.random.normal(ka, (B, FEATURE_DIM, H, W), jnp.float32).astype(jnp.bfloat16)
    positive = jax.random.normal(kpz, (B, FEATURE_DIM, H, W), jnp.float32).astype(jnp.bfloat16)
    negative = jax.random.normal(kn, (B, FEATURE_DIM, H, W), jnp.float32).astype(jnp.bfloat16)

    fwd = jax.jit(triplet_forward)
    emb_a, emb_p, emb_n = fwd(anchor, positive, negative, params)
    jax.block_until_ready((emb_a, emb_p, emb_n))

    # Correctness check against a plain-JAX reference of the same head.
    ref_a = _reference_forward_one(anchor, params)
    ref_p = _reference_forward_one(positive, params)
    ref_n = _reference_forward_one(negative, params)
    assert emb_a.shape == (B, EMBED_DIM) and emb_a.dtype == jnp.float32
    np.testing.assert_allclose(np.asarray(emb_a), np.asarray(ref_a), atol=2e-3, rtol=2e-3)
    np.testing.assert_allclose(np.asarray(emb_p), np.asarray(ref_p), atol=2e-3, rtol=2e-3)
    np.testing.assert_allclose(np.asarray(emb_n), np.asarray(ref_n), atol=2e-3, rtol=2e-3)

    print("KERNEL_OK")
</pallas_src>

<mosaic_0001>
module attributes {stable_mosaic.version = 11 : i64} {
  func.func @_embed_head_kernel(%arg0: i32, %arg1: memref<6x1280xbf16, #tpu.memory_space<vmem>>, %arg2: memref<1280x512xbf16, #tpu.memory_space<vmem>>, %arg3: memref<1x512xf32, #tpu.memory_space<vmem>>, %arg4: memref<512x128xbf16, #tpu.memory_space<vmem>>, %arg5: memref<1x128xf32, #tpu.memory_space<vmem>>, %arg6: memref<6x128xf32, #tpu.memory_space<vmem>>) attributes {dimension_semantics = [#tpu.dimension_semantics<parallel>], iteration_bounds = array<i64: 1>, scalar_prefetch = 0 : i64, scratch_operands = 0 : i64, tpu.core_type = #tpu.core_type<tc>, window_params = [{transform_indices = @transform_0, window_bounds = array<i64: 6, 1280>}, {pipeline_mode = #tpu.pipeline_mode<synchronous>, transform_indices = @transform_1, window_bounds = array<i64: 1280, 512>}, {pipeline_mode = #tpu.pipeline_mode<synchronous>, transform_indices = @transform_2, window_bounds = array<i64: 1, 512>}, {pipeline_mode = #tpu.pipeline_mode<synchronous>, transform_indices = @transform_3, window_bounds = array<i64: 512, 128>}, {pipeline_mode = #tpu.pipeline_mode<synchronous>, transform_indices = @transform_4, window_bounds = array<i64: 1, 128>}, {transform_indices = @transform_5, window_bounds = array<i64: 6, 128>}]} {
    %c0 = arith.constant 0 : index
    %c0_0 = arith.constant 0 : index
    %0 = vector.load %arg1[%c0, %c0_0] : memref<6x1280xbf16, #tpu.memory_space<vmem>>, vector<6x1280xbf16>
    %c0_1 = arith.constant 0 : index
    %c0_2 = arith.constant 0 : index
    %1 = vector.load %arg2[%c0_1, %c0_2] : memref<1280x512xbf16, #tpu.memory_space<vmem>>, vector<1280x512xbf16>
    %cst = arith.constant dense<0.000000e+00> : vector<6x512xf32>
    %2 = tpu.matmul %0, %1, %cst {dimension_numbers = #tpu.dot_dimension_numbers<[1], [0], [0], [1], [0, 0, 1, 1], [], []>} : vector<6x1280xbf16>, vector<1280x512xbf16>, vector<6x512xf32> -> vector<6x512xf32>
    %c0_3 = arith.constant 0 : index
    %c0_4 = arith.constant 0 : index
    %3 = vector.load %arg3[%c0_3, %c0_4] : memref<1x512xf32, #tpu.memory_space<vmem>>, vector<1x512xf32>
    %4 = vector.broadcast %3 : vector<1x512xf32> to vector<6x512xf32>
    %5 = arith.addf %2, %4 : vector<6x512xf32>
    %cst_5 = arith.constant 0.000000e+00 : f32
    %6 = vector.broadcast %cst_5 : f32 to vector<6x512xf32>
    %7 = arith.maximumf %5, %6 : vector<6x512xf32>
    %8 = arith.truncf %7 : vector<6x512xf32> to vector<6x512xbf16>
    %c0_6 = arith.constant 0 : index
    %c0_7 = arith.constant 0 : index
    %9 = vector.load %arg4[%c0_6, %c0_7] : memref<512x128xbf16, #tpu.memory_space<vmem>>, vector<512x128xbf16>
    %cst_8 = arith.constant dense<0.000000e+00> : vector<6x128xf32>
    %10 = tpu.matmul %8, %9, %cst_8 {dimension_numbers = #tpu.dot_dimension_numbers<[1], [0], [0], [1], [0, 0, 1, 1], [], []>} : vector<6x512xbf16>, vector<512x128xbf16>, vector<6x128xf32> -> vector<6x128xf32>
    %c0_9 = arith.constant 0 : index
    %c0_10 = arith.constant 0 : index
    %11 = vector.load %arg5[%c0_9, %c0_10] : memref<1x128xf32, #tpu.memory_space<vmem>>, vector<1x128xf32>
    %12 = vector.broadcast %11 : vector<1x128xf32> to vector<6x128xf32>
    %13 = arith.addf %10, %12 : vector<6x128xf32>
    %14 = arith.mulf %13, %13 : vector<6x128xf32>
    %cst_11 = arith.constant dense<0.000000e+00> : vector<6xf32>
    %15 = vector.multi_reduction <add>, %14, %cst_11 [1] : vector<6x128xf32> to vector<6xf32>
    %16 = vector.shape_cast %15 : vector<6xf32> to vector<6x1xf32>
    %cst_12 = arith.constant 1.000000e-24 : f32
    %17 = vector.broadcast %cst_12 : f32 to vector<6x1xf32>
    %18 = arith.maximumf %16, %17 : vector<6x1xf32>
    %19 = math.rsqrt %18 : vector<6x1xf32>
    %20 = vector.broadcast %19 : vector<6x1xf32> to vector<6x128xf32>
    %21 = arith.mulf %13, %20 : vector<6x128xf32>
    %c0_13 = arith.constant 0 : index
    %c0_14 = arith.constant 0 : index
    %22 = vector.load %arg6[%c0_13, %c0_14] : memref<6x128xf32, #tpu.memory_space<vmem>>, vector<6x128xf32>
    tpu.vector_store %arg6[%c0_13, %c0_14], %21 {strides = array<i32>} : memref<6x128xf32, #tpu.memory_space<vmem>>, vector<6x128xf32>,
    return
  }
  func.func @transform_0(%arg0: i32) -> (i32, i32) {
    %c0_i32 = arith.constant 0 : i32
    %c0_i32_0 = arith.constant 0 : i32
    return %arg0, %c0_i32 : i32, i32
  }
  func.func @transform_1(%arg0: i32) -> (i32, i32) {
    %c0_i32 = arith.constant 0 : i32
    %c0_i32_0 = arith.constant 0 : i32
    %c0_i32_1 = arith.constant 0 : i32
    return %c0_i32, %c0_i32_0 : i32, i32
  }
  func.func @transform_2(%arg0: i32) -> (i32, i32) {
    %c0_i32 = arith.constant 0 : i32
    %c0_i32_0 = arith.constant 0 : i32
    %c0_i32_1 = arith.constant 0 : i32
    return %c0_i32, %c0_i32_0 : i32, i32
  }
  func.func @transform_3(%arg0: i32) -> (i32, i32) {
    %c0_i32 = arith.constant 0 : i32
    %c0_i32_0 = arith.constant 0 : i32
    %c0_i32_1 = arith.constant 0 : i32
    return %c0_i32, %c0_i32_0 : i32, i32
  }
  func.func @transform_4(%arg0: i32) -> (i32, i32) {
    %c0_i32 = arith.constant 0 : i32
    %c0_i32_0 = arith.constant 0 : i32
    %c0_i32_1 = arith.constant 0 : i32
    return %c0_i32, %c0_i32_0 : i32, i32
  }
  func.func @transform_5(%arg0: i32) -> (i32, i32) {
    %c0_i32 = arith.constant 0 : i32
    %c0_i32_0 = arith.constant 0 : i32
    return %arg0, %c0_i32 : i32, i32
  }
}

</mosaic_0001>

<bundles_post_ra>
// kernel: triplet_forward.1
= control target key start
LH: loop header
LB: loop body
LE: loop exit
PB: predicated region body
PF: predicated region fallthrough
CT: control target
= control target key end

     0   :  { %10 = vsyncpa [#allocation3], 0  ;;  %s4035_s0 = inlined_call_operand.vmem [shape: bf16[6,1280], index: 0, kind: input, shape index: {}]   ;;  %s4036_s1 = inlined_call_operand.hbm [shape: bf16[1280,512], index: 1, kind: input, shape index: {}]   ;;  %s4037_s2 = inlined_call_operand.hbm [shape: f32[1,512], index: 2, kind: input, shape index: {}]   ;;  %s4038_s3 = inlined_call_operand.hbm [shape: bf16[512,128], index: 3, kind: input, shape index: {}]   ;;  %s4039_s4 = inlined_call_operand.hbm [shape: f32[1,128], index: 4, kind: input, shape index: {}]   ;;  %s4040_s5 = inlined_call_operand.vmem [shape: f32[6,128], index: 5, kind: output, shape index: {}]  }
   0x1   :  { %11 = vsyncpa [#allocation5], 0 }
   0x2   :  { %12 = vsyncpa [#allocation8], 0  ;;  %s3900_s18 = smov [#allocation4]   ;;  %s3901_s20 = smov [#allocation2]  }
   0x3   :  { %s33_s19 = sshll.u32 %s3900_s18, 4  ;;  %s20_s21 = sshll.u32 %s3901_s20, 4  ;;  %s34_s19 = int_to_ptr.vmem [resolvable:$true] %s33_s19  ;;  %s3938_s21 = int_to_ptr.vmem [resolvable:$true] %s20_s21 }
   0x4   :  { %s3806_s24 = scalar_lea.hbm %s4037_s2, 64 }
   0x5   :  { %p3807_p0 = scmp.ne.s32.totalorder %s4037_s2, %s3806_s24  ;;  %p3810_p1 = scmp.lt.u32.totalorder %s3806_s24, %s4037_s2 }
   0x7   :  { %p3812_p2 = pnand %p3810_p1, %p3807_p0 }
   0x9   :  { %3815 = shalt.err (!%p3812_p2)
}
   0xa   :  { %s3816_s29 = scalar_lea.vmem %s34_s19, 64  ;;  %p3821_p4 = scmp.lt.s32.totalorder %s34_s19, %s34_s19 }
   0xb   :  { %p3817_p3 = scmp.ne.s32.totalorder %s34_s19, %s3816_s29  ;;  %p3822_p5 = scmp.lt.s32.totalorder %s3816_s29, %s3816_s29 }
   0xd   :  { %p3823_p6 = por %p3822_p5, %p3821_p4 }
   0xf   :  { %p3824_p7 = pnand %p3823_p6, %p3817_p3 }
  0x11   :  { %3827 = shalt.err (!%p3824_p7)
}
  0x12   :  { %36 = dma.hbm_to_vmem [thread:$0]  %s4037_s2, 64, %s34_s19, [#allocation5]  }
  0x13   :  { %s3828_s9 = scalar_lea.hbm %s4036_s1, 40960 }
  0x14   :  { %p3829_p8 = scmp.ne.s32.totalorder %s4036_s1, %s3828_s9  ;;  %p3832_p9 = scmp.lt.u32.totalorder %s3828_s9, %s4036_s1 }
  0x16   :  { %p3834_p10 = pnand %p3832_p9, %p3829_p8 }
  0x18   :  { %3837 = shalt.err (!%p3834_p10)
}
  0x19   :  { %s3838_s14 = scalar_lea.vmem %s3938_s21, 40960  ;;  %p3843_p12 = scmp.lt.s32.totalorder %s3938_s21, %s3938_s21 }
  0x1a   :  { %p3839_p11 = scmp.ne.s32.totalorder %s3938_s21, %s3838_s14  ;;  %p3844_p13 = scmp.lt.s32.totalorder %s3838_s14, %s3838_s14 }
  0x1c   :  { %p3845_p0 = por %p3844_p13, %p3843_p12 }
  0x1e   :  { %p3846_p1 = pnand %p3845_p0, %p3839_p11 }
  0x20   :  { %3849 = shalt.err (!%p3846_p1)
}
  0x21   :  { %s3902_s2 = smov 256   ;;  %s3903_s15 = smov 16  }
  0x22   :  { %26 = dma.hbm_to_vmem [thread:$0]  %s4036_s1, 40960, %s3938_s21, [#allocation3], %s3902_s2, %s3902_s2, %s3903_s15  }
  0x23   :  { %s3904_s18 = smov [#allocation6]   ;;  %s3850_s23 = scalar_lea.hbm %s4038_s3, 4096 }
  0x24   :  { %s42_s19 = sshll.u32 %s3904_s18, 4  ;;  %p3851_p2 = scmp.ne.s32.totalorder %s4038_s3, %s3850_s23  ;;  %s43_s19 = int_to_ptr.vmem [resolvable:$true] %s42_s19 }
  0x25   :  { %p3854_p3 = scmp.lt.u32.totalorder %s3850_s23, %s4038_s3 }
  0x27   :  { %p3856_p4 = pnand %p3854_p3, %p3851_p2 }
  0x29   :  { %3859 = shalt.err (!%p3856_p4)
}
  0x2a   :  { %s3860_s28 = scalar_lea.vmem %s43_s19, 4096  ;;  %p3865_p6 = scmp.lt.s32.totalorder %s43_s19, %s43_s19 }
  0x2b   :  { %p3861_p5 = scmp.ne.s32.totalorder %s43_s19, %s3860_s28  ;;  %p3866_p7 = scmp.lt.s32.totalorder %s3860_s28, %s3860_s28 }
  0x2d   :  { %p3867_p8 = por %p3866_p7, %p3865_p6 }
  0x2f   :  { %p3868_p9 = pnand %p3867_p8, %p3861_p5 }
  0x31   :  { %3871 = shalt.err (!%p3868_p9)
}
  0x32   :  { %s3905_s1 = smov 64   ;;  %s3906_s21 = smov 4  }
  0x33   :  { %48 = dma.hbm_to_vmem [thread:$0]  %s4038_s3, 4096, %s43_s19, [#allocation5], %s3905_s1, %s3905_s1, %s3906_s21  }
  0x34   :  { %s3907_s6 = smov [#allocation7]   ;;  %s3872_s10 = scalar_lea.hbm %s4039_s4, 16 }
  0x35   :  { %s55_s7 = sshll.u32 %s3907_s6, 4  ;;  %p3873_p10 = scmp.ne.s32.totalorder %s4039_s4, %s3872_s10  ;;  %s56_s7 = int_to_ptr.vmem [resolvable:$true] %s55_s7 }
  0x36   :  { %p3876_p11 = scmp.lt.u32.totalorder %s3872_s10, %s4039_s4 }
  0x38   :  { %p3878_p12 = pnand %p3876_p11, %p3873_p10 }
  0x3a   :  { %3881 = shalt.err (!%p3878_p12)
}
  0x3b   :  { %s3882_s2 = scalar_lea.vmem %s56_s7, 16  ;;  %s3886_s3 = scalar_lea.vmem %s56_s7, 32 }
  0x3c   :  { %p3883_p13 = scmp.ne.s32.totalorder %s56_s7, %s3882_s2  ;;  %p3887_p0 = scmp.lt.s32.totalorder %s56_s7, %s56_s7 }
  0x3d   :  { %p3888_p1 = scmp.lt.s32.totalorder %s3886_s3, %s3882_s2 }
  0x3f   :  { %p3889_p2 = por %p3888_p1, %p3887_p0 }
  0x41   :  { %p3890_p3 = pnand %p3889_p2, %p3883_p13 }
  0x43   :  { %3893 = shalt.err (!%p3890_p3)
}
  0x44   :  { %58 = dma.hbm_to_vmem [thread:$0]  %s4039_s4, 16, %s56_s7, [#allocation8]  }
  0x45   :  { %3894 = dma.done.wait [#allocation3], 40960  }
  0x46   :  { %3895 = vsyncadd [#allocation3], 4294926336 }
  0x47   :  { %3896 = dma.done.wait [#allocation5], 4160  }
  0x48   :  { %3897 = vsyncadd [#allocation5], 4294963136 }
  0x49   :  { %3898 = dma.done.wait [#allocation8], 16  }
  0x4a   :  { %3899 = vsyncadd [#allocation8], 4294967280  ;;  %v3282_v0 = vld [vmem:[#allocation2 + $0x4] ss:$16 sps:$4 sm:$0xff]   ;;  %v3284_v1 = vld [vmem:[#allocation2 + $0xc] ss:$16 sps:$4 sm:$0xff]  }
  0x4b   :  { %2054 = vmatprep.subr.bf16.mxu0 %v3282_v0  ;;  %v3286_v2 = vld [vmem:[#allocation2] ss:$16 sps:$4 sm:$0xff]   ;;  %v3287_v3 = vld [vmem:[#allocation2 + $0x8] ss:$16 sps:$4 sm:$0xff]   ;;  %2259 = vmatprep.subr.bf16.mxu1 %v3284_v1  ;;  %v3288_v4 = vld [vmem:[#allocation2 + $0x24] ss:$16 sps:$4 sm:$0xff]  }
  0x4c   :  { %2055 = vmatpush1.bf16.msra.mxu0 %v3286_v2  ;;  %2260 = vmatpush1.bf16.msra.mxu1 %v3287_v3  ;;  %v3290_v5 = vld [vmem:[#allocation2 + $0x2c] ss:$16 sps:$4 sm:$0xff]   ;;  %v3292_v6 = vld [vmem:[#allocation2 + $0x20] ss:$16 sps:$4 sm:$0xff]   ;;  %v3293_v7 = vld [vmem:[#allocation2 + $0x28] ss:$16 sps:$4 sm:$0xff]  }
  0x4d   :  { %2056 = vmatprep.subr.bf16.mxu0 %v3288_v4  ;;  %2261 = vmatprep.subr.bf16.mxu1 %v3290_v5  ;;  %v3294_v8 = vld [vmem:[#allocation2 + $0x44] ss:$16 sps:$4 sm:$0xff]   ;;  %v3296_v9 = vld [vmem:[#allocation2 + $0x4c] ss:$16 sps:$4 sm:$0xff]   ;;  %v3298_v10 = vld [vmem:[#allocation2 + $0x40] ss:$16 sps:$4 sm:$0xff]  }
  0x4e   :  { %v3299_v11 = vld [vmem:[#allocation2 + $0x48] ss:$16 sps:$4 sm:$0xff]   ;;  %v3300_v12 = vld [vmem:[#allocation2 + $0x64] ss:$16 sps:$4 sm:$0xff]   ;;  %v3302_v13 = vld [vmem:[#allocation2 + $0x6c] ss:$16 sps:$4 sm:$0xff]  }
  0x4f   :  { %v3304_v14 = vld [vmem:[#allocation2 + $0x60] ss:$16 sps:$4 sm:$0xff]   ;;  %v3305_v15 = vld [vmem:[#allocation2 + $0x68] ss:$16 sps:$4 sm:$0xff]   ;;  %v3306_v16 = vld [vmem:[#allocation2 + $0x84] ss:$16 sps:$4 sm:$0xff]  }
  0x50   :  { %2057 = vmatpush1.bf16.msra.mxu0 %v3292_v6  ;;  %2262 = vmatpush1.bf16.msra.mxu1 %v3293_v7  ;;  %v3308_v17 = vld [vmem:[#allocation2 + $0x8c] ss:$16 sps:$4 sm:$0xff]   ;;  %v3310_v18 = vld [vmem:[#allocation2 + $0x80] ss:$16 sps:$4 sm:$0xff]   ;;  %v3311_v19 = vld [vmem:[#allocation2 + $0x88] ss:$16 sps:$4 sm:$0xff]  }
  0x51   :  { %2058 = vmatprep.subr.bf16.mxu0 %v3294_v8  ;;  %2263 = vmatprep.subr.bf16.mxu1 %v3296_v9  ;;  %v3312_v20 = vld [vmem:[#allocation2 + $0xa4] ss:$16 sps:$4 sm:$0xff]   ;;  %v3314_v21 = vld [vmem:[#allocation2 + $0xac] ss:$16 sps:$4 sm:$0xff]   ;;  %v3316_v22 = vld [vmem:[#allocation2 + $0xa0] ss:$16 sps:$4 sm:$0xff]  }
  0x52   :  { %v3317_v23 = vld [vmem:[#allocation2 + $0xa8] ss:$16 sps:$4 sm:$0xff]   ;;  %v3318_v24 = vld [vmem:[#allocation2 + $0xc4] ss:$16 sps:$4 sm:$0xff]   ;;  %v3320_v25 = vld [vmem:[#allocation2 + $0xcc] ss:$16 sps:$4 sm:$0xff]  }
  0x53   :  { %v3322_v26 = vld [vmem:[#allocation2 + $0xc0] ss:$16 sps:$4 sm:$0xff]   ;;  %v3323_v27 = vld [vmem:[#allocation2 + $0xc8] ss:$16 sps:$4 sm:$0xff]   ;;  %v3324_v28 = vld [vmem:[#allocation2 + $0xe4] ss:$16 sps:$4 sm:$0xff]  }
  0x54   :  { %2059 = vmatpush1.bf16.msra.mxu0 %v3298_v10  ;;  %2264 = vmatpush1.bf16.msra.mxu1 %v3299_v11  ;;  %v3326_v29 = vld [vmem:[#allocation2 + $0xec] ss:$16 sps:$4 sm:$0xff]   ;;  %v3328_v30 = vld [vmem:[#allocation2 + $0xe0] ss:$16 sps:$4 sm:$0xff]   ;;  %v3329_v31 = vld [vmem:[#allocation2 + $0xe8] ss:$16 sps:$4 sm:$0xff]  }
  0x55   :  { %2060 = vmatprep.subr.bf16.mxu0 %v3300_v12  ;;  %2265 = vmatprep.subr.bf16.mxu1 %v3302_v13  ;;  %v3330_v32 = vld [vmem:[#allocation2 + $0x104] ss:$16 sps:$4 sm:$0xff]   ;;  %v3332_v33 = vld [vmem:[#allocation2 + $0x10c] ss:$16 sps:$4 sm:$0xff]   ;;  %v3334_v34 = vld [vmem:[#allocation2 + $0x100] ss:$16 sps:$4 sm:$0xff]  }
  0x56   :  { %v3335_v35 = vld [vmem:[#allocation2 + $0x108] ss:$16 sps:$4 sm:$0xff]   ;;  %v3336_v36 = vld [vmem:[#allocation2 + $0x124] ss:$16 sps:$4 sm:$0xff]   ;;  %v3338_v37 = vld [vmem:[#allocation2 + $0x12c] ss:$16 sps:$4 sm:$0xff]  }
  0x57   :  { %v3340_v38 = vld [vmem:[#allocation2 + $0x120] ss:$16 sps:$4 sm:$0xff]   ;;  %v3341_v39 = vld [vmem:[#allocation2 + $0x128] ss:$16 sps:$4 sm:$0xff]   ;;  %v3342_v40 = vld [vmem:[#allocation2 + $0x144] ss:$16 sps:$4 sm:$0xff]  }
  0x58   :  { %2061 = vmatpush1.bf16.msra.mxu0 %v3304_v14  ;;  %2266 = vmatpush1.bf16.msra.mxu1 %v3305_v15  ;;  %v3344_v41 = vld [vmem:[#allocation2 + $0x14c] ss:$16 sps:$4 sm:$0xff]   ;;  %v3346_v42 = vld [vmem:[#allocation2 + $0x140] ss:$16 sps:$4 sm:$0xff]   ;;  %v3347_v43 = vld [vmem:[#allocation2 + $0x148] ss:$16 sps:$4 sm:$0xff]  }
  0x59   :  { %2062 = vmatprep.subr.bf16.mxu0 %v3306_v16  ;;  %2267 = vmatprep.subr.bf16.mxu1 %v3308_v17  ;;  %v3348_v44 = vld [vmem:[#allocation2 + $0x164] ss:$16 sps:$4 sm:$0xff]   ;;  %v3350_v45 = vld [vmem:[#allocation2 + $0x16c] ss:$16 sps:$4 sm:$0xff]   ;;  %v3352_v47 = vld [vmem:[#allocation2 + $0x160] ss:$16 sps:$4 sm:$0xff]  }
  0x5a   :  { %v72_v46 = vld [vmem:[%s4035_s0] sm:$0x77]  ;;  %v3353_v49 = vld [vmem:[#allocation2 + $0x168] ss:$16 sps:$4 sm:$0xff]   ;;  %v3356_v51 = vld [vmem:[#allocation2 + $0x18c] ss:$16 sps:$4 sm:$0xff]  }
  0x5b   :  { %v2832_v48 = vcombine.high %v72_v46, %v72_v46  ;;  %v3354_v50 = vld [vmem:[#allocation2 + $0x184] ss:$16 sps:$4 sm:$0xff]   ;;  %v3358_v52 = vld [vmem:[#allocation2 + $0x180] ss:$16 sps:$4 sm:$0xff]   ;;  %v3359_v53 = vld [vmem:[#allocation2 + $0x188] ss:$16 sps:$4 sm:$0xff]   ;;  %v2831_v4 = vcombine.low %v72_v46, %v72_v46 }
  0x5c   :  { %2063 = vmatpush1.bf16.msra.mxu0 %v3310_v18  ;;  %2268 = vmatpush1.bf16.msra.mxu1 %v3311_v19  ;;  %v3360_v54 = vld [vmem:[#allocation2 + $0x1a4] ss:$16 sps:$4 sm:$0xff]   ;;  %v3362_v55 = vld [vmem:[#allocation2 + $0x1ac] ss:$16 sps:$4 sm:$0xff]   ;;  %v3364_v56 = vld [vmem:[#allocation2 + $0x1a0] ss:$16 sps:$4 sm:$0xff]  }
  0x5d   :  { %2064 = vmatprep.subr.bf16.mxu0 %v3312_v20  ;;  %2269 = vmatprep.subr.bf16.mxu1 %v3314_v21  ;;  %v3365_v57 = vld [vmem:[#allocation2 + $0x1a8] ss:$16 sps:$4 sm:$0xff]   ;;  %v3366_v58 = vld [vmem:[#allocation2 + $0x1c4] ss:$16 sps:$4 sm:$0xff]   ;;  %v3368_v59 = vld [vmem:[#allocation2 + $0x1cc] ss:$16 sps:$4 sm:$0xff]  }
  0x5e   :  { %2086 = vmatprep.mubr.bf16.mxu0 %v2832_v48  ;;  %2291 = vmatprep.mubr.bf16.mxu1 %v2832_v48  ;;  %v3370_v60 = vld [vmem:[#allocation2 + $0x1c0] ss:$16 sps:$4 sm:$0xff]   ;;  %v3371_v61 = vld [vmem:[#allocation2 + $0x1c8] ss:$16 sps:$4 sm:$0xff]   ;;  %v3372_v62 = vld [vmem:[#allocation2 + $0x1e4] ss:$16 sps:$4 sm:$0xff]  }
  0x5f   :  { %v3374_v63 = vld [vmem:[#allocation2 + $0x1ec] ss:$16 sps:$4 sm:$0xff]   ;;  %v3376_v0 = vld [vmem:[#allocation2 + $0x1e0] ss:$16 sps:$4 sm:$0xff]   ;;  %v3377_v1 = vld [vmem:[#allocation2 + $0x1e8] ss:$16 sps:$4 sm:$0xff]  }
  0x60   :  { %2065 = vmatpush1.bf16.msra.mxu0 %v3316_v22  ;;  %2270 = vmatpush1.bf16.msra.mxu1 %v3317_v23  ;;  %v3382_v2 = vld [vmem:[#allocation2 + $0x204] ss:$16 sps:$4 sm:$0xff]   ;;  %v3385_v3 = vld [vmem:[#allocation2 + $0x20c] ss:$16 sps:$4 sm:$0xff]   ;;  %v3380_v5 = vld [vmem:[#allocation2 + $0x200] ss:$16 sps:$4 sm:$0xff]  }
  0x61   :  { %2066 = vmatprep.subr.bf16.mxu0 %v3318_v24  ;;  %2271 = vmatprep.subr.bf16.mxu1 %v3320_v25  ;;  %v3383_v6 = vld [vmem:[#allocation2 + $0x208] ss:$16 sps:$4 sm:$0xff]   ;;  %v3388_v7 = vld [vmem:[#allocation2 + $0x224] ss:$16 sps:$4 sm:$0xff]   ;;  %v3391_v8 = vld [vmem:[#allocation2 + $0x22c] ss:$16 sps:$4 sm:$0xff]  }
  0x62   :  { %v3386_v9 = vld [vmem:[#allocation2 + $0x220] ss:$16 sps:$4 sm:$0xff]   ;;  %v3389_v10 = vld [vmem:[#allocation2 + $0x228] ss:$16 sps:$4 sm:$0xff]   ;;  %v3394_v11 = vld [vmem:[#allocation2 + $0x244] ss:$16 sps:$4 sm:$0xff]  }
  0x63   :  { %v3397_v12 = vld [vmem:[#allocation2 + $0x24c] ss:$16 sps:$4 sm:$0xff]   ;;  %v3392_v13 = vld [vmem:[#allocation2 + $0x240] ss:$16 sps:$4 sm:$0xff]   ;;  %v3395_v14 = vld [vmem:[#allocation2 + $0x248] ss:$16 sps:$4 sm:$0xff]  }
  0x64   :  { %2067 = vmatpush1.bf16.msra.mxu0 %v3322_v26  ;;  %2272 = vmatpush1.bf16.msra.mxu1 %v3323_v27  ;;  %v3400_v15 = vld [vmem:[#allocation2 + $0x264] ss:$16 sps:$4 sm:$0xff]   ;;  %v3403_v16 = vld [vmem:[#allocation2 + $0x26c] ss:$16 sps:$4 sm:$0xff]   ;;  %v3398_v17 = vld [vmem:[#allocation2 + $0x260] ss:$16 sps:$4 sm:$0xff]  }
  0x65   :  { %2068 = vmatprep.subr.bf16.mxu0 %v3324_v28  ;;  %2273 = vmatprep.subr.bf16.mxu1 %v3326_v29  ;;  %v3401_v18 = vld [vmem:[#allocation2 + $0x268] ss:$16 sps:$4 sm:$0xff]   ;;  %v3406_v19 = vld [vmem:[#allocation2 + $0x284] ss:$16 sps:$4 sm:$0xff]   ;;  %v3409_v20 = vld [vmem:[#allocation2 + $0x28c] ss:$16 sps:$4 sm:$0xff]  }
  0x66   :  { %v3404_v21 = vld [vmem:[#allocation2 + $0x280] ss:$16 sps:$4 sm:$0xff]   ;;  %v3407_v22 = vld [vmem:[#allocation2 + $0x288] ss:$16 sps:$4 sm:$0xff]   ;;  %v3412_v23 = vld [vmem:[#allocation2 + $0x2a4] ss:$16 sps:$4 sm:$0xff]  }
  0x67   :  { %v3415_v24 = vld [vmem:[#allocation2 + $0x2ac] ss:$16 sps:$4 sm:$0xff]   ;;  %v3410_v25 = vld [vmem:[#allocation2 + $0x2a0] ss:$16 sps:$4 sm:$0xff]   ;;  %v3413_v26 = vld [vmem:[#allocation2 + $0x2a8] ss:$16 sps:$4 sm:$0xff]  }
  0x68   :  { %2069 = vmatpush1.bf16.msra.mxu0 %v3328_v30  ;;  %2274 = vmatpush1.bf16.msra.mxu1 %v3329_v31  ;;  %v3418_v27 = vld [vmem:[#allocation2 + $0x2c4] ss:$16 sps:$4 sm:$0xff]   ;;  %v3421_v28 = vld [vmem:[#allocation2 + $0x2cc] ss:$16 sps:$4 sm:$0xff]   ;;  %v3416_v31 = vld [vmem:[#allocation2 + $0x2c0] ss:$16 sps:$4 sm:$0xff]  }
  0x69   :  { %2070 = vmatprep.subr.bf16.mxu0 %v3330_v32  ;;  %2275 = vmatprep.subr.bf16.mxu1 %v3332_v33  ;;  %v3999_v29 = vld [vmem:[%s4035_s0 + $0x8] sm:$0x77]  ;;  %v3424_v33 = vld [vmem:[#allocation2 + $0x2e4] ss:$16 sps:$4 sm:$0xff]   ;;  %vm2816_vm0 = vcmask 1045504  }
  0x6a   :  { %v2834_v30 = vcombine.high %v3999_v29, %v3999_v29  ;;  %v3419_v32 = vld [vmem:[#allocation2 + $0x2c8] ss:$16 sps:$4 sm:$0xff]   ;;  %v3445_v46 = vld [vmem:[#allocation2 + $0x34c] ss:$16 sps:$4 sm:$0xff]  }
  0x6b   :  { %v3443_v48 = vld [vmem:[#allocation2 + $0x348] ss:$16 sps:$4 sm:$0xff]  }
  0x6c   :  { %2071 = vmatpush1.bf16.msra.mxu0 %v3334_v34  ;;  %2276 = vmatpush1.bf16.msra.mxu1 %v3335_v35  ;;  %v3427_v34 = vld [vmem:[#allocation2 + $0x2ec] ss:$16 sps:$4 sm:$0xff]   ;;  %v3422_v35 = vld [vmem:[#allocation2 + $0x2e0] ss:$16 sps:$4 sm:$0xff]  }
  0x6d   :  { %2072 = vmatprep.subr.bf16.mxu0 %v3336_v36  ;;  %2277 = vmatprep.subr.bf16.mxu1 %v3338_v37  ;;  %v3425_v36 = vld [vmem:[#allocation2 + $0x2e8] ss:$16 sps:$4 sm:$0xff]   ;;  %v3430_v37 = vld [vmem:[#allocation2 + $0x304] ss:$16 sps:$4 sm:$0xff]  }
  0x70   :  { %2073 = vmatpush1.bf16.msra.mxu0 %v3340_v38  ;;  %2278 = vmatpush1.bf16.msra.mxu1 %v3341_v39  ;;  %v3433_v38 = vld [vmem:[#allocation2 + $0x30c] ss:$16 sps:$4 sm:$0xff]   ;;  %v3428_v39 = vld [vmem:[#allocation2 + $0x300] ss:$16 sps:$4 sm:$0xff]  }
  0x71   :  { %2074 = vmatprep.subr.bf16.mxu0 %v3342_v40  ;;  %2279 = vmatprep.subr.bf16.mxu1 %v3344_v41  ;;  %v3431_v40 = vld [vmem:[#allocation2 + $0x308] ss:$16 sps:$4 sm:$0xff]   ;;  %v3436_v41 = vld [vmem:[#allocation2 + $0x324] ss:$16 sps:$4 sm:$0xff]  }
  0x74   :  { %2075 = vmatpush1.bf16.msra.mxu0 %v3346_v42  ;;  %2280 = vmatpush1.bf16.msra.mxu1 %v3347_v43  ;;  %v3439_v42 = vld [vmem:[#allocation2 + $0x32c] ss:$16 sps:$4 sm:$0xff]   ;;  %v3434_v43 = vld [vmem:[#allocation2 + $0x320] ss:$16 sps:$4 sm:$0xff]  }
  0x75   :  { %2076 = vmatprep.subr.bf16.mxu0 %v3348_v44  ;;  %2281 = vmatprep.subr.bf16.mxu1 %v3350_v45  ;;  %v3437_v44 = vld [vmem:[#allocation2 + $0x328] ss:$16 sps:$4 sm:$0xff]   ;;  %v3442_v45 = vld [vmem:[#allocation2 + $0x344] ss:$16 sps:$4 sm:$0xff]  }
  0x78   :  { %2077 = vmatpush1.bf16.msra.mxu0 %v3352_v47  ;;  %2282 = vmatpush1.bf16.msra.mxu1 %v3353_v49  ;;  %v3440_v47 = vld [vmem:[#allocation2 + $0x340] ss:$16 sps:$4 sm:$0xff]   ;;  %v3448_v49 = vld [vmem:[#allocation2 + $0x364] ss:$16 sps:$4 sm:$0xff]  }
  0x79   :  { %2078 = vmatprep.subr.bf16.mxu0 %v3354_v50  ;;  %2283 = vmatprep.subr.bf16.mxu1 %v3356_v51  ;;  %v3451_v50 = vld [vmem:[#allocation2 + $0x36c] ss:$16 sps:$4 sm:$0xff]   ;;  %v3446_v51 = vld [vmem:[#allocation2 + $0x360] ss:$16 sps:$4 sm:$0xff]  }
  0x7c   :  { %2079 = vmatpush1.bf16.msra.mxu0 %v3358_v52  ;;  %2284 = vmatpush1.bf16.msra.mxu1 %v3359_v53  ;;  %v3449_v52 = vld [vmem:[#allocation2 + $0x368] ss:$16 sps:$4 sm:$0xff]   ;;  %v3454_v53 = vld [vmem:[#allocation2 + $0x384] ss:$16 sps:$4 sm:$0xff]  }
  0x7d   :  { %2080 = vmatprep.subr.bf16.mxu0 %v3360_v54  ;;  %2285 = vmatprep.subr.bf16.mxu1 %v3362_v55  ;;  %v3457_v54 = vld [vmem:[#allocation2 + $0x38c] ss:$16 sps:$4 sm:$0xff]   ;;  %v3452_v55 = vld [vmem:[#allocation2 + $0x380] ss:$16 sps:$4 sm:$0xff]  }
  0x80   :  { %2081 = vmatpush1.bf16.msra.mxu0 %v3364_v56  ;;  %2286 = vmatpush1.bf16.msra.mxu1 %v3365_v57  ;;  %v3455_v56 = vld [vmem:[#allocation2 + $0x388] ss:$16 sps:$4 sm:$0xff]   ;;  %v3460_v57 = vld [vmem:[#allocation2 + $0x3a4] ss:$16 sps:$4 sm:$0xff]  }
  0x81   :  { %2082 = vmatprep.subr.bf16.mxu0 %v3366_v58  ;;  %2287 = vmatprep.subr.bf16.mxu1 %v3368_v59  ;;  %v3463_v58 = vld [vmem:[#allocation2 + $0x3ac] ss:$16 sps:$4 sm:$0xff]   ;;  %v3458_v59 = vld [vmem:[#allocation2 + $0x3a0] ss:$16 sps:$4 sm:$0xff]  }
  0x84   :  { %2083 = vmatpush1.bf16.msra.mxu0 %v3370_v60  ;;  %2288 = vmatpush1.bf16.msra.mxu1 %v3371_v61  ;;  %v3461_v60 = vld [vmem:[#allocation2 + $0x3a8] ss:$16 sps:$4 sm:$0xff]   ;;  %v3466_v61 = vld [vmem:[#allocation2 + $0x3c4] ss:$16 sps:$4 sm:$0xff]  }
  0x85   :  { %2084 = vmatprep.subr.bf16.mxu0 %v3372_v62  ;;  %2289 = vmatprep.subr.bf16.mxu1 %v3374_v63  ;;  %v3469_v62 = vld [vmem:[#allocation2 + $0x3cc] ss:$16 sps:$4 sm:$0xff]   ;;  %v3464_v63 = vld [vmem:[#allocation2 + $0x3c0] ss:$16 sps:$4 sm:$0xff]  }
  0x88   :  { %2085 = vmatpush1.bf16.msra.mxu0 %v3376_v0  ;;  %2290 = vmatpush1.bf16.msra.mxu1 %v3377_v1  ;;  %v3467_v0 = vld [vmem:[#allocation2 + $0x3c8] ss:$16 sps:$4 sm:$0xff]   ;;  %v3472_v1 = vld [vmem:[#allocation2 + $0x3e4] ss:$16 sps:$4 sm:$0xff]  }
  0x89   :  { %2095 = vmatprep.subr.bf16.mxu0 %v3382_v2  ;;  %2300 = vmatprep.subr.bf16.mxu1 %v3385_v3  ;;  %v3475_v2 = vld [vmem:[#allocation2 + $0x3ec] ss:$16 sps:$4 sm:$0xff]   ;;  %v3470_v3 = vld [vmem:[#allocation2 + $0x3e0] ss:$16 sps:$4 sm:$0xff]  }
  0x8b   :  { %2087 = vmatmul.mubr.bf16.vlgmr.msra.gmra.mrb[0].mxu0 %v2831_v4  ;;  %2292 = vmatmul.mubr.bf16.vlgmr.msra.gmra.mrb[0].mxu1 %v2831_v4  ;;  %v3473_v4 = vld [vmem:[#allocation2 + $0x3e8] ss:$16 sps:$4 sm:$0xff]  }
  0x8c   :  { %2096 = vmatpush1.bf16.msra.mxu0 %v3380_v5  ;;  %2301 = vmatpush1.bf16.msra.mxu1 %v3383_v6  ;;  %v3480_v5 = vld [vmem:[#allocation2 + $0x404] ss:$16 sps:$4 sm:$0xff]   ;;  %v3483_v6 = vld [vmem:[#allocation2 + $0x40c] ss:$16 sps:$4 sm:$0xff]  }
  0x8d   :  { %2097 = vmatprep.subr.bf16.mxu0 %v3388_v7  ;;  %2302 = vmatprep.subr.bf16.mxu1 %v3391_v8  ;;  %v2833_v7 = vcombine.low %v3999_v29, %v3999_v29  ;;  %v3478_v8 = vld [vmem:[#allocation2 + $0x400] ss:$16 sps:$4 sm:$0xff]   ;;  %v3513_v29 = vld [vmem:[#allocation2 + $0x4ac] ss:$16 sps:$4 sm:$0xff]  }
  0x8e   :  { %2127 = vmatprep.mubr.bf16.mxu0 %v2834_v30  ;;  %2332 = vmatprep.mubr.bf16.mxu1 %v2834_v30  ;;  %v3508_v30 = vld [vmem:[#allocation2 + $0x4a0] ss:$16 sps:$4 sm:$0xff]  }
  0x90   :  { %2098 = vmatpush1.bf16.msra.mxu0 %v3386_v9  ;;  %2303 = vmatpush1.bf16.msra.mxu1 %v3389_v10  ;;  %v3481_v9 = vld [vmem:[#allocation2 + $0x408] ss:$16 sps:$4 sm:$0xff]   ;;  %v3486_v10 = vld [vmem:[#allocation2 + $0x424] ss:$16 sps:$4 sm:$0xff]  }
  0x91   :  { %2099 = vmatprep.subr.bf16.mxu0 %v3394_v11  ;;  %2304 = vmatprep.subr.bf16.mxu1 %v3397_v12  ;;  %v4008_v11 = vld [vmem:[%s4035_s0 + $0x10] sm:$0x77]  ;;  %v3489_v12 = vld [vmem:[#allocation2 + $0x42c] ss:$16 sps:$4 sm:$0xff]  }
  0x94   :  { %2100 = vmatpush1.bf16.msra.mxu0 %v3392_v13  ;;  %2305 = vmatpush1.bf16.msra.mxu1 %v3395_v14  ;;  %v2836_v13 = vcombine.high %v4008_v11, %v4008_v11  ;;  %v3484_v14 = vld [vmem:[#allocation2 + $0x420] ss:$16 sps:$4 sm:$0xff]  }
  0x95   :  { %2101 = vmatprep.subr.bf16.mxu0 %v3400_v15  ;;  %2306 = vmatprep.subr.bf16.mxu1 %v3403_v16  ;;  %v3487_v15 = vld [vmem:[#allocation2 + $0x428] ss:$16 sps:$4 sm:$0xff]   ;;  %v3492_v16 = vld [vmem:[#allocation2 + $0x444] ss:$16 sps:$4 sm:$0xff]  }
  0x98   :  { %2102 = vmatpush1.bf16.msra.mxu0 %v3398_v17  ;;  %2307 = vmatpush1.bf16.msra.mxu1 %v3401_v18  ;;  %v3495_v17 = vld [vmem:[#allocation2 + $0x44c] ss:$16 sps:$4 sm:$0xff]   ;;  %v3490_v18 = vld [vmem:[#allocation2 + $0x440] ss:$16 sps:$4 sm:$0xff]  }
  0x99   :  { %2103 = vmatprep.subr.bf16.mxu0 %v3406_v19  ;;  %2308 = vmatprep.subr.bf16.mxu1 %v3409_v20  ;;  %v3493_v19 = vld [vmem:[#allocation2 + $0x448] ss:$16 sps:$4 sm:$0xff]   ;;  %v3498_v20 = vld [vmem:[#allocation2 + $0x464] ss:$16 sps:$4 sm:$0xff]  }
  0x9c   :  { %2104 = vmatpush1.bf16.msra.mxu0 %v3404_v21  ;;  %2309 = vmatpush1.bf16.msra.mxu1 %v3407_v22  ;;  %v3501_v21 = vld [vmem:[#allocation2 + $0x46c] ss:$16 sps:$4 sm:$0xff]   ;;  %v3496_v22 = vld [vmem:[#allocation2 + $0x460] ss:$16 sps:$4 sm:$0xff]  }
  0x9d   :  { %2105 = vmatprep.subr.bf16.mxu0 %v3412_v23  ;;  %2310 = vmatprep.subr.bf16.mxu1 %v3415_v24  ;;  %v3499_v23 = vld [vmem:[#allocation2 + $0x468] ss:$16 sps:$4 sm:$0xff]   ;;  %v3504_v24 = vld [vmem:[#allocation2 + $0x484] ss:$16 sps:$4 sm:$0xff]  }
  0xa0   :  { %2106 = vmatpush1.bf16.msra.mxu0 %v3410_v25  ;;  %2311 = vmatpush1.bf16.msra.mxu1 %v3413_v26  ;;  %v3507_v25 = vld [vmem:[#allocation2 + $0x48c] ss:$16 sps:$4 sm:$0xff]   ;;  %v3502_v26 = vld [vmem:[#allocation2 + $0x480] ss:$16 sps:$4 sm:$0xff]  }
  0xa1   :  { %2107 = vmatprep.subr.bf16.mxu0 %v3418_v27  ;;  %2312 = vmatprep.subr.bf16.mxu1 %v3421_v28  ;;  %v3505_v27 = vld [vmem:[#allocation2 + $0x488] ss:$16 sps:$4 sm:$0xff]   ;;  %v3510_v28 = vld [vmem:[#allocation2 + $0x4a4] ss:$16 sps:$4 sm:$0xff]  }
  0xa4   :  { %2108 = vmatpush1.bf16.msra.mxu0 %v3416_v31  ;;  %2313 = vmatpush1.bf16.msra.mxu1 %v3419_v32  ;;  %v3511_v31 = vld [vmem:[#allocation2 + $0x4a8] ss:$16 sps:$4 sm:$0xff]   ;;  %v3516_v32 = vld [vmem:[#allocation2 + $0x4c4] ss:$16 sps:$4 sm:$0xff]  }
  0xa5   :  { %2109 = vmatprep.subr.bf16.mxu0 %v3424_v33  ;;  %2314 = vmatprep.subr.bf16.mxu1 %v3427_v34  ;;  %v3519_v33 = vld [vmem:[#allocation2 + $0x4cc] ss:$16 sps:$4 sm:$0xff]   ;;  %v3514_v34 = vld [vmem:[#allocation2 + $0x4c0] ss:$16 sps:$4 sm:$0xff]  }
  0xa8   :  { %2110 = vmatpush1.bf16.msra.mxu0 %v3422_v35  ;;  %2315 = vmatpush1.bf16.msra.mxu1 %v3425_v36  ;;  %v3517_v35 = vld [vmem:[#allocation2 + $0x4c8] ss:$16 sps:$4 sm:$0xff]   ;;  %v3522_v36 = vld [vmem:[#allocation2 + $0x4e4] ss:$16 sps:$4 sm:$0xff]  }
  0xa9   :  { %2111 = vmatprep.subr.bf16.mxu0 %v3430_v37  ;;  %2316 = vmatprep.subr.bf16.mxu1 %v3433_v38  ;;  %v3525_v37 = vld [vmem:[#allocation2 + $0x4ec] ss:$16 sps:$4 sm:$0xff]   ;;  %v3520_v38 = vld [vmem:[#allocation2 + $0x4e0] ss:$16 sps:$4 sm:$0xff]  }
  0xac   :  { %2112 = vmatpush1.bf16.msra.mxu0 %v3428_v39  ;;  %2317 = vmatpush1.bf16.msra.mxu1 %v3431_v40  ;;  %v3523_v39 = vld [vmem:[#allocation2 + $0x4e8] ss:$16 sps:$4 sm:$0xff]   ;;  %v3528_v40 = vld [vmem:[#allocation2 + $0x504] ss:$16 sps:$4 sm:$0xff]  }
  0xad   :  { %2113 = vmatprep.subr.bf16.mxu0 %v3436_v41  ;;  %2318 = vmatprep.subr.bf16.mxu1 %v3439_v42  ;;  %v3531_v41 = vld [vmem:[#allocation2 + $0x50c] ss:$16 sps:$4 sm:$0xff]   ;;  %v3526_v42 = vld [vmem:[#allocation2 + $0x500] ss:$16 sps:$4 sm:$0xff]  }
  0xb0   :  { %2114 = vmatpush1.bf16.msra.mxu0 %v3434_v43  ;;  %2319 = vmatpush1.bf16.msra.mxu1 %v3437_v44  ;;  %v3529_v43 = vld [vmem:[#allocation2 + $0x508] ss:$16 sps:$4 sm:$0xff]   ;;  %v3534_v44 = vld [vmem:[#allocation2 + $0x524] ss:$16 sps:$4 sm:$0xff]  }
  0xb1   :  { %2115 = vmatprep.subr.bf16.mxu0 %v3442_v45  ;;  %2320 = vmatprep.subr.bf16.mxu1 %v3445_v46  ;;  %v3537_v45 = vld [vmem:[#allocation2 + $0x52c] ss:$16 sps:$4 sm:$0xff]   ;;  %v3532_v46 = vld [vmem:[#allocation2 + $0x520] ss:$16 sps:$4 sm:$0xff]  }
  0xb4   :  { %2116 = vmatpush1.bf16.msra.mxu0 %v3440_v47  ;;  %2321 = vmatpush1.bf16.msra.mxu1 %v3443_v48  ;;  %v3535_v47 = vld [vmem:[#allocation2 + $0x528] ss:$16 sps:$4 sm:$0xff]   ;;  %v3540_v48 = vld [vmem:[#allocation2 + $0x544] ss:$16 sps:$4 sm:$0xff]  }
  0xb5   :  { %2117 = vmatprep.subr.bf16.mxu0 %v3448_v49  ;;  %2322 = vmatprep.subr.bf16.mxu1 %v3451_v50  ;;  %v3543_v49 = vld [vmem:[#allocation2 + $0x54c] ss:$16 sps:$4 sm:$0xff]   ;;  %v3538_v50 = vld [vmem:[#allocation2 + $0x540] ss:$16 sps:$4 sm:$0xff]  }
  0xb8   :  { %2118 = vmatpush1.bf16.msra.mxu0 %v3446_v51  ;;  %2323 = vmatpush1.bf16.msra.mxu1 %v3449_v52  ;;  %v3541_v51 = vld [vmem:[#allocation2 + $0x548] ss:$16 sps:$4 sm:$0xff]   ;;  %v3546_v52 = vld [vmem:[#allocation2 + $0x564] ss:$16 sps:$4 sm:$0xff]  }
  0xb9   :  { %2119 = vmatprep.subr.bf16.mxu0 %v3454_v53  ;;  %2324 = vmatprep.subr.bf16.mxu1 %v3457_v54  ;;  %v3549_v53 = vld [vmem:[#allocation2 + $0x56c] ss:$16 sps:$4 sm:$0xff]   ;;  %v3544_v54 = vld [vmem:[#allocation2 + $0x560] ss:$16 sps:$4 sm:$0xff]  }
  0xbc   :  { %2120 = vmatpush1.bf16.msra.mxu0 %v3452_v55  ;;  %2325 = vmatpush1.bf16.msra.mxu1 %v3455_v56  ;;  %v3547_v55 = vld [vmem:[#allocation2 + $0x568] ss:$16 sps:$4 sm:$0xff]   ;;  %v3552_v56 = vld [vmem:[#allocation2 + $0x584] ss:$16 sps:$4 sm:$0xff]  }
  0xbd   :  { %2121 = vmatprep.subr.bf16.mxu0 %v3460_v57  ;;  %2326 = vmatprep.subr.bf16.mxu1 %v3463_v58  ;;  %v3555_v57 = vld [vmem:[#allocation2 + $0x58c] ss:$16 sps:$4 sm:$0xff]   ;;  %v3550_v58 = vld [vmem:[#allocation2 + $0x580] ss:$16 sps:$4 sm:$0xff]  }
  0xc0   :  { %2122 = vmatpush1.bf16.msra.mxu0 %v3458_v59  ;;  %2327 = vmatpush1.bf16.msra.mxu1 %v3461_v60  ;;  %v3553_v59 = vld [vmem:[#allocation2 + $0x588] ss:$16 sps:$4 sm:$0xff]   ;;  %v3558_v60 = vld [vmem:[#allocation2 + $0x5a4] ss:$16 sps:$4 sm:$0xff]  }
  0xc1   :  { %2123 = vmatprep.subr.bf16.mxu0 %v3466_v61  ;;  %2328 = vmatprep.subr.bf16.mxu1 %v3469_v62  ;;  %v3561_v61 = vld [vmem:[#allocation2 + $0x5ac] ss:$16 sps:$4 sm:$0xff]   ;;  %v3556_v62 = vld [vmem:[#allocation2 + $0x5a0] ss:$16 sps:$4 sm:$0xff]  }
  0xc4   :  { %2124 = vmatpush1.bf16.msra.mxu0 %v3464_v63  ;;  %2329 = vmatpush1.bf16.msra.mxu1 %v3467_v0  ;;  %v3559_v63 = vld [vmem:[#allocation2 + $0x5a8] ss:$16 sps:$4 sm:$0xff]   ;;  %v3564_v0 = vld [vmem:[#allocation2 + $0x5c4] ss:$16 sps:$4 sm:$0xff]  }
  0xc5   :  { %2125 = vmatprep.subr.bf16.mxu0 %v3472_v1  ;;  %2330 = vmatprep.subr.bf16.mxu1 %v3475_v2  ;;  %v3567_v1 = vld [vmem:[#allocation2 + $0x5cc] ss:$16 sps:$4 sm:$0xff]   ;;  %v3562_v2 = vld [vmem:[#allocation2 + $0x5c0] ss:$16 sps:$4 sm:$0xff]  }
  0xc8   :  { %2126 = vmatpush1.bf16.msra.mxu0 %v3470_v3  ;;  %2331 = vmatpush1.bf16.msra.mxu1 %v3473_v4  ;;  %v3565_v3 = vld [vmem:[#allocation2 + $0x5c8] ss:$16 sps:$4 sm:$0xff]   ;;  %v3570_v4 = vld [vmem:[#allocation2 + $0x5e4] ss:$16 sps:$4 sm:$0xff]  }
  0xc9   :  { %2136 = vmatprep.subr.bf16.mxu0 %v3480_v5  ;;  %2341 = vmatprep.subr.bf16.mxu1 %v3483_v6  ;;  %v3573_v5 = vld [vmem:[#allocation2 + $0x5ec] ss:$16 sps:$4 sm:$0xff]   ;;  %v3568_v6 = vld [vmem:[#allocation2 + $0x5e0] ss:$16 sps:$4 sm:$0xff]  }
  0xcb   :  { %2128 = vmatmul.mubr.bf16.vlgmr.msra.gmra.mrb[0].mxu0 %v2833_v7  ;;  %2333 = vmatmul.mubr.bf16.vlgmr.msra.gmra.mrb[0].mxu1 %v2833_v7  ;;  %v3571_v7 = vld [vmem:[#allocation2 + $0x5e8] ss:$16 sps:$4 sm:$0xff]  }
  0xcc   :  { %2137 = vmatpush1.bf16.msra.mxu0 %v3478_v8  ;;  %2342 = vmatpush1.bf16.msra.mxu1 %v3481_v9  ;;  %v3578_v8 = vld [vmem:[#allocation2 + $0x604] ss:$16 sps:$4 sm:$0xff]   ;;  %v3581_v9 = vld [vmem:[#allocation2 + $0x60c] ss:$16 sps:$4 sm:$0xff]  }
  0xcd   :  { %2138 = vmatprep.subr.bf16.mxu0 %v3486_v10  ;;  %2343 = vmatprep.subr.bf16.mxu1 %v3489_v12  ;;  %v3576_v10 = vld [vmem:[#allocation2 + $0x600] ss:$16 sps:$4 sm:$0xff]   ;;  %v2835_v12 = vcombine.low %v4008_v11, %v4008_v11  ;;  %v3590_v11 = vld [vmem:[#allocation2 + $0x644] ss:$16 sps:$4 sm:$0xff]  }
  0xce   :  { %2168 = vmatprep.mubr.bf16.mxu0 %v2836_v13  ;;  %2373 = vmatprep.mubr.bf16.mxu1 %v2836_v13  ;;  %v3579_v13 = vld [vmem:[#allocation2 + $0x608] ss:$16 sps:$4 sm:$0xff]  }
  0xd0   :  { %2139 = vmatpush1.bf16.msra.mxu0 %v3484_v14  ;;  %2344 = vmatpush1.bf16.msra.mxu1 %v3487_v15  ;;  %v4017_v14 = vld [vmem:[%s4035_s0 + $0x18] sm:$0x77]  ;;  %v3584_v15 = vld [vmem:[#allocation2 + $0x624] ss:$16 sps:$4 sm:$0xff]  }
  0xd1   :  { %2140 = vmatprep.subr.bf16.mxu0 %v3492_v16  ;;  %2345 = vmatprep.subr.bf16.mxu1 %v3495_v17  ;;  %v3587_v16 = vld [vmem:[#allocation2 + $0x62c] ss:$16 sps:$4 sm:$0xff]   ;;  %v2838_v17 = vcombine.high %v4017_v14, %v4017_v14 }
  0xd4   :  { %2141 = vmatpush1.bf16.msra.mxu0 %v3490_v18  ;;  %2346 = vmatpush1.bf16.msra.mxu1 %v3493_v19  ;;  %v3582_v18 = vld [vmem:[#allocation2 + $0x620] ss:$16 sps:$4 sm:$0xff]   ;;  %v3585_v19 = vld [vmem:[#allocation2 + $0x628] ss:$16 sps:$4 sm:$0xff]  }
  0xd5   :  { %2142 = vmatprep.subr.bf16.mxu0 %v3498_v20  ;;  %2347 = vmatprep.subr.bf16.mxu1 %v3501_v21  ;;  %v3593_v20 = vld [vmem:[#allocation2 + $0x64c] ss:$16 sps:$4 sm:$0xff]   ;;  %v3588_v21 = vld [vmem:[#allocation2 + $0x640] ss:$16 sps:$4 sm:$0xff]  }
  0xd8   :  { %2143 = vmatpush1.bf16.msra.mxu0 %v3496_v22  ;;  %2348 = vmatpush1.bf16.msra.mxu1 %v3499_v23  ;;  %v3591_v22 = vld [vmem:[#allocation2 + $0x648] ss:$16 sps:$4 sm:$0xff]   ;;  %v3596_v23 = vld [vmem:[#allocation2 + $0x664] ss:$16 sps:$4 sm:$0xff]  }
  0xd9   :  { %2144 = vmatprep.subr.bf16.mxu0 %v3504_v24  ;;  %2349 = vmatprep.subr.bf16.mxu1 %v3507_v25  ;;  %v3599_v24 = vld [vmem:[#allocation2 + $0x66c] ss:$16 sps:$4 sm:$0xff]   ;;  %v3594_v25 = vld [vmem:[#allocation2 + $0x660] ss:$16 sps:$4 sm:$0xff]  }
  0xdc   :  { %2145 = vmatpush1.bf16.msra.mxu0 %v3502_v26  ;;  %2350 = vmatpush1.bf16.msra.mxu1 %v3505_v27  ;;  %v3597_v26 = vld [vmem:[#allocation2 + $0x668] ss:$16 sps:$4 sm:$0xff]   ;;  %v3602_v27 = vld [vmem:[#allocation2 + $0x684] ss:$16 sps:$4 sm:$0xff]  }
  0xdd   :  { %2146 = vmatprep.subr.bf16.mxu0 %v3510_v28  ;;  %2351 = vmatprep.subr.bf16.mxu1 %v3513_v29  ;;  %v3605_v28 = vld [vmem:[#allocation2 + $0x68c] ss:$16 sps:$4 sm:$0xff]   ;;  %v3600_v29 = vld [vmem:[#allocation2 + $0x680] ss:$16 sps:$4 sm:$0xff]  }
  0xe0   :  { %2147 = vmatpush1.bf16.msra.mxu0 %v3508_v30  ;;  %2352 = vmatpush1.bf16.msra.mxu1 %v3511_v31  ;;  %v3603_v30 = vld [vmem:[#allocation2 + $0x688] ss:$16 sps:$4 sm:$0xff]   ;;  %v3608_v31 = vld [vmem:[#allocation2 + $0x6a4] ss:$16 sps:$4 sm:$0xff]  }
  0xe1   :  { %2148 = vmatprep.subr.bf16.mxu0 %v3516_v32  ;;  %2353 = vmatprep.subr.bf16.mxu1 %v3519_v33  ;;  %v3611_v32 = vld [vmem:[#allocation2 + $0x6ac] ss:$16 sps:$4 sm:$0xff]   ;;  %v3606_v33 = vld [vmem:[#allocation2 + $0x6a0] ss:$16 sps:$4 sm:$0xff]  }
  0xe4   :  { %2149 = vmatpush1.bf16.msra.mxu0 %v3514_v34  ;;  %2354 = vmatpush1.bf16.msra.mxu1 %v3517_v35  ;;  %v3609_v34 = vld [vmem:[#allocation2 + $0x6a8] ss:$16 sps:$4 sm:$0xff]   ;;  %v3614_v35 = vld [vmem:[#allocation2 + $0x6c4] ss:$16 sps:$4 sm:$0xff]  }
  0xe5   :  { %2150 = vmatprep.subr.bf16.mxu0 %v3522_v36  ;;  %2355 = vmatprep.subr.bf16.mxu1 %v3525_v37  ;;  %v3617_v36 = vld [vmem:[#allocation2 + $0x6cc] ss:$16 sps:$4 sm:$0xff]   ;;  %v3612_v37 = vld [vmem:[#allocation2 + $0x6c0] ss:$16 sps:$4 sm:$0xff]  }
  0xe8   :  { %2151 = vmatpush1.bf16.msra.mxu0 %v3520_v38  ;;  %2356 = vmatpush1.bf16.msra.mxu1 %v3523_v39  ;;  %v3615_v38 = vld [vmem:[#allocation2 + $0x6c8] ss:$16 sps:$4 sm:$0xff]   ;;  %v3620_v39 = vld [vmem:[#allocation2 + $0x6e4] ss:$16 sps:$4 sm:$0xff]  }
  0xe9   :  { %2152 = vmatprep.subr.bf16.mxu0 %v3528_v40  ;;  %2357 = vmatprep.subr.bf16.mxu1 %v3531_v41  ;;  %v3623_v40 = vld [vmem:[#allocation2 + $0x6ec] ss:$16 sps:$4 sm:$0xff]   ;;  %v3618_v41 = vld [vmem:[#allocation2 + $0x6e0] ss:$16 sps:$4 sm:$0xff]  }
  0xec   :  { %2153 = vmatpush1.bf16.msra.mxu0 %v3526_v42  ;;  %2358 = vmatpush1.bf16.msra.mxu1 %v3529_v43  ;;  %v3621_v42 = vld [vmem:[#allocation2 + $0x6e8] ss:$16 sps:$4 sm:$0xff]   ;;  %v3626_v43 = vld [vmem:[#allocation2 + $0x704] ss:$16 sps:$4 sm:$0xff]  }
  0xed   :  { %2154 = vmatprep.subr.bf16.mxu0 %v3534_v44  ;;  %2359 = vmatprep.subr.bf16.mxu1 %v3537_v45  ;;  %v3629_v44 = vld [vmem:[#allocation2 + $0x70c] ss:$16 sps:$4 sm:$0xff]   ;;  %v3624_v45 = vld [vmem:[#allocation2 + $0x700] ss:$16 sps:$4 sm:$0xff]  }
  0xf0   :  { %2155 = vmatpush1.bf16.msra.mxu0 %v3532_v46  ;;  %2360 = vmatpush1.bf16.msra.mxu1 %v3535_v47  ;;  %v3627_v46 = vld [vmem:[#allocation2 + $0x708] ss:$16 sps:$4 sm:$0xff]   ;;  %v3632_v47 = vld [vmem:[#allocation2 + $0x724] ss:$16 sps:$4 sm:$0xff]  }
  0xf1   :  { %2156 = vmatprep.subr.bf16.mxu0 %v3540_v48  ;;  %2361 = vmatprep.subr.bf16.mxu1 %v3543_v49  ;;  %v3635_v48 = vld [vmem:[#allocation2 + $0x72c] ss:$16 sps:$4 sm:$0xff]   ;;  %v3630_v49 = vld [vmem:[#allocation2 + $0x720] ss:$16 sps:$4 sm:$0xff]  }
  0xf4   :  { %2157 = vmatpush1.bf16.msra.mxu0 %v3538_v50  ;;  %2362 = vmatpush1.bf16.msra.mxu1 %v3541_v51  ;;  %v3633_v50 = vld [vmem:[#allocation2 + $0x728] ss:$16 sps:$4 sm:$0xff]   ;;  %v3638_v51 = vld [vmem:[#allocation2 + $0x744] ss:$16 sps:$4 sm:$0xff]  }
  0xf5   :  { %2158 = vmatprep.subr.bf16.mxu0 %v3546_v52  ;;  %2363 = vmatprep.subr.bf16.mxu1 %v3549_v53  ;;  %v3641_v52 = vld [vmem:[#allocation2 + $0x74c] ss:$16 sps:$4 sm:$0xff]   ;;  %v3636_v53 = vld [vmem:[#allocation2 + $0x740] ss:$16 sps:$4 sm:$0xff]  }
  0xf8   :  { %2159 = vmatpush1.bf16.msra.mxu0 %v3544_v54  ;;  %2364 = vmatpush1.bf16.msra.mxu1 %v3547_v55  ;;  %v3639_v54 = vld [vmem:[#allocation2 + $0x748] ss:$16 sps:$4 sm:$0xff]   ;;  %v3644_v55 = vld [vmem:[#allocation2 + $0x764] ss:$16 sps:$4 sm:$0xff]  }
  0xf9   :  { %2160 = vmatprep.subr.bf16.mxu0 %v3552_v56  ;;  %2365 = vmatprep.subr.bf16.mxu1 %v3555_v57  ;;  %v3647_v56 = vld [vmem:[#allocation2 + $0x76c] ss:$16 sps:$4 sm:$0xff]   ;;  %v3642_v57 = vld [vmem:[#allocation2 + $0x760] ss:$16 sps:$4 sm:$0xff]  }
  0xfc   :  { %2161 = vmatpush1.bf16.msra.mxu0 %v3550_v58  ;;  %2366 = vmatpush1.bf16.msra.mxu1 %v3553_v59  ;;  %v3645_v58 = vld [vmem:[#allocation2 + $0x768] ss:$16 sps:$4 sm:$0xff]   ;;  %v3650_v59 = vld [vmem:[#allocation2 + $0x784] ss:$16 sps:$4 sm:$0xff]  }
  0xfd   :  { %2162 = vmatprep.subr.bf16.mxu0 %v3558_v60  ;;  %2367 = vmatprep.subr.bf16.mxu1 %v3561_v61  ;;  %v3653_v60 = vld [vmem:[#allocation2 + $0x78c] ss:$16 sps:$4 sm:$0xff]   ;;  %v3648_v61 = vld [vmem:[#allocation2 + $0x780] ss:$16 sps:$4 sm:$0xff]  }
 0x100   :  { %2163 = vmatpush1.bf16.msra.mxu0 %v3556_v62  ;;  %2368 = vmatpush1.bf16.msra.mxu1 %v3559_v63  ;;  %v3651_v62 = vld [vmem:[#allocation2 + $0x788] ss:$16 sps:$4 sm:$0xff]   ;;  %v3656_v63 = vld [vmem:[#allocation2 + $0x7a4] ss:$16 sps:$4 sm:$0xff]  }
 0x101   :  { %2164 = vmatprep.subr.bf16.mxu0 %v3564_v0  ;;  %2369 = vmatprep.subr.bf16.mxu1 %v3567_v1  ;;  %v3659_v0 = vld [vmem:[#allocation2 + $0x7ac] ss:$16 sps:$4 sm:$0xff]   ;;  %v3654_v1 = vld [vmem:[#allocation2 + $0x7a0] ss:$16 sps:$4 sm:$0xff]  }
 0x104   :  { %2165 = vmatpush1.bf16.msra.mxu0 %v3562_v2  ;;  %2370 = vmatpush1.bf16.msra.mxu1 %v3565_v3  ;;  %v3657_v2 = vld [vmem:[#allocation2 + $0x7a8] ss:$16 sps:$4 sm:$0xff]   ;;  %v3662_v3 = vld [vmem:[#allocation2 + $0x7c4] ss:$16 sps:$4 sm:$0xff]  }
 0x105   :  { %2166 = vmatprep.subr.bf16.mxu0 %v3570_v4  ;;  %2371 = vmatprep.subr.bf16.mxu1 %v3573_v5  ;;  %v3665_v4 = vld [vmem:[#allocation2 + $0x7cc] ss:$16 sps:$4 sm:$0xff]   ;;  %v3660_v5 = vld [vmem:[#allocation2 + $0x7c0] ss:$16 sps:$4 sm:$0xff]  }
 0x108   :  { %2167 = vmatpush1.bf16.msra.mxu0 %v3568_v6  ;;  %2372 = vmatpush1.bf16.msra.mxu1 %v3571_v7  ;;  %v3663_v6 = vld [vmem:[#allocation2 + $0x7c8] ss:$16 sps:$4 sm:$0xff]   ;;  %v3668_v7 = vld [vmem:[#allocation2 + $0x7e4] ss:$16 sps:$4 sm:$0xff]  }
 0x109   :  { %2177 = vmatprep.subr.bf16.mxu0 %v3578_v8  ;;  %2382 = vmatprep.subr.bf16.mxu1 %v3581_v9  ;;  %v3671_v8 = vld [vmem:[#allocation2 + $0x7ec] ss:$16 sps:$4 sm:$0xff]   ;;  %v3666_v9 = vld [vmem:[#allocation2 + $0x7e0] ss:$16 sps:$4 sm:$0xff]  }
 0x10b   :  { %2169 = vmatmul.mubr.bf16.vlgmr.msra.gmra.mrb[0].mxu0 %v2835_v12  ;;  %2374 = vmatmul.mubr.bf16.vlgmr.msra.gmra.mrb[0].mxu1 %v2835_v12  ;;  %v3676_v12 = vld [vmem:[#allocation2 + $0x804] ss:$16 sps:$4 sm:$0xff]  }
 0x10c   :  { %2178 = vmatpush1.bf16.msra.mxu0 %v3576_v10  ;;  %2383 = vmatpush1.bf16.msra.mxu1 %v3579_v13  ;;  %v3669_v10 = vld [vmem:[#allocation2 + $0x7e8] ss:$16 sps:$4 sm:$0xff]   ;;  %v3679_v13 = vld [vmem:[#allocation2 + $0x80c] ss:$16 sps:$4 sm:$0xff]  }
 0x10d   :  { %2179 = vmatprep.subr.bf16.mxu0 %v3584_v15  ;;  %2384 = vmatprep.subr.bf16.mxu1 %v3587_v16  ;;  %v2837_v15 = vcombine.low %v4017_v14, %v4017_v14  ;;  %v4026_v16 = vld [vmem:[%s4035_s0 + $0x20] sm:$0x77] }
 0x10e   :  { %2209 = vmatprep.mubr.bf16.mxu0 %v2838_v17  ;;  %2414 = vmatprep.mubr.bf16.mxu1 %v2838_v17  ;;  %v3674_v17 = vld [vmem:[#allocation2 + $0x800] ss:$16 sps:$4 sm:$0xff]  }
 0x10f   :  { %v3680_v14 = vld [vmem:[#allocation2 + $0x820] ss:$16 sps:$4 sm:$0xff]  }
 0x110   :  { %2180 = vmatpush1.bf16.msra.mxu0 %v3582_v18  ;;  %2385 = vmatpush1.bf16.msra.mxu1 %v3585_v19  ;;  %v3677_v18 = vld [vmem:[#allocation2 + $0x808] ss:$16 sps:$4 sm:$0xff]   ;;  %v3682_v19 = vld [vmem:[#allocation2 + $0x824] ss:$16 sps:$4 sm:$0xff]  }
 0x111   :  { %2181 = vmatprep.subr.bf16.mxu0 %v3590_v11  ;;  %2386 = vmatprep.subr.bf16.mxu1 %v3593_v20  ;;  %v3685_v11 = vld [vmem:[#allocation2 + $0x82c] ss:$16 sps:$4 sm:$0xff]   ;;  %v2840_v20 = vcombine.high %v4026_v16, %v4026_v16 }
 0x114   :  { %2182 = vmatpush1.bf16.msra.mxu0 %v3588_v21  ;;  %2387 = vmatpush1.bf16.msra.mxu1 %v3591_v22  ;;  %v3683_v21 = vld [vmem:[#allocation2 + $0x828] ss:$16 sps:$4 sm:$0xff]   ;;  %v3688_v22 = vld [vmem:[#allocation2 + $0x844] ss:$16 sps:$4 sm:$0xff]  }
 0x115   :  { %2183 = vmatprep.subr.bf16.mxu0 %v3596_v23  ;;  %2388 = vmatprep.subr.bf16.mxu1 %v3599_v24  ;;  %v3691_v23 = vld [vmem:[#allocation2 + $0x84c] ss:$16 sps:$4 sm:$0xff]   ;;  %v3686_v24 = vld [vmem:[#allocation2 + $0x840] ss:$16 sps:$4 sm:$0xff]  }
 0x118   :  { %2184 = vmatpush1.bf16.msra.mxu0 %v3594_v25  ;;  %2389 = vmatpush1.bf16.msra.mxu1 %v3597_v26  ;;  %v3689_v25 = vld [vmem:[#allocation2 + $0x848] ss:$16 sps:$4 sm:$0xff]   ;;  %v3694_v26 = vld [vmem:[#allocation2 + $0x864] ss:$16 sps:$4 sm:$0xff]  }
 0x119   :  { %2185 = vmatprep.subr.bf16.mxu0 %v3602_v27  ;;  %2390 = vmatprep.subr.bf16.mxu1 %v3605_v28  ;;  %v3697_v27 = vld [vmem:[#allocation2 + $0x86c] ss:$16 sps:$4 sm:$0xff]   ;;  %v3692_v28 = vld [vmem:[#allocation2 + $0x860] ss:$16 sps:$4 sm:$0xff]  }
 0x11c   :  { %2186 = vmatpush1.bf16.msra.mxu0 %v3600_v29  ;;  %2391 = vmatpush1.bf16.msra.mxu1 %v3603_v30  ;;  %v3695_v29 = vld [vmem:[#allocation2 + $0x868] ss:$16 sps:$4 sm:$0xff]   ;;  %v3700_v30 = vld [vmem:[#allocation2 + $0x884] ss:$16 sps:$4 sm:$0xff]  }
 0x11d   :  { %2187 = vmatprep.subr.bf16.mxu0 %v3608_v31  ;;  %2392 = vmatprep.subr.bf16.mxu1 %v3611_v32  ;;  %v3703_v31 = vld [vmem:[#allocation2 + $0x88c] ss:$16 sps:$4 sm:$0xff]   ;;  %v3698_v32 = vld [vmem:[#allocation2 + $0x880] ss:$16 sps:$4 sm:$0xff]  }
 0x120   :  { %2188 = vmatpush1.bf16.msra.mxu0 %v3606_v33  ;;  %2393 = vmatpush1.bf16.msra.mxu1 %v3609_v34  ;;  %v3701_v33 = vld [vmem:[#allocation2 + $0x888] ss:$16 sps:$4 sm:$0xff]   ;;  %v3706_v34 = vld [vmem:[#allocation2 + $0x8a4] ss:$16 sps:$4 sm:$0xff]  }
 0x121   :  { %2189 = vmatprep.subr.bf16.mxu0 %v3614_v35  ;;  %2394 = vmatprep.subr.bf16.mxu1 %v3617_v36  ;;  %v3709_v35 = vld [vmem:[#allocation2 + $0x8ac] ss:$16 sps:$4 sm:$0xff]   ;;  %v3704_v36 = vld [vmem:[#allocation2 + $0x8a0] ss:$16 sps:$4 sm:$0xff]  }
 0x124   :  { %2190 = vmatpush1.bf16.msra.mxu0 %v3612_v37  ;;  %2395 = vmatpush1.bf16.msra.mxu1 %v3615_v38  ;;  %v3707_v37 = vld [vmem:[#allocation2 + $0x8a8] ss:$16 sps:$4 sm:$0xff]   ;;  %v3712_v38 = vld [vmem:[#allocation2 + $0x8c4] ss:$16 sps:$4 sm:$0xff]  }
 0x125   :  { %2191 = vmatprep.subr.bf16.mxu0 %v3620_v39  ;;  %2396 = vmatprep.subr.bf16.mxu1 %v3623_v40  ;;  %v3715_v39 = vld [vmem:[#allocation2 + $0x8cc] ss:$16 sps:$4 sm:$0xff]   ;;  %v3710_v40 = vld [vmem:[#allocation2 + $0x8c0] ss:$16 sps:$4 sm:$0xff]  }
 0x128   :  { %2192 = vmatpush1.bf16.msra.mxu0 %v3618_v41  ;;  %2397 = vmatpush1.bf16.msra.mxu1 %v3621_v42  ;;  %v3713_v41 = vld [vmem:[#allocation2 + $0x8c8] ss:$16 sps:$4 sm:$0xff]   ;;  %v3718_v42 = vld [vmem:[#allocation2 + $0x8e4] ss:$16 sps:$4 sm:$0xff]  }
 0x129   :  { %2193 = vmatprep.subr.bf16.mxu0 %v3626_v43  ;;  %2398 = vmatprep.subr.bf16.mxu1 %v3629_v44  ;;  %v3721_v43 = vld [vmem:[#allocation2 + $0x8ec] ss:$16 sps:$4 sm:$0xff]   ;;  %v3716_v44 = vld [vmem:[#allocation2 + $0x8e0] ss:$16 sps:$4 sm:$0xff]  }
 0x12c   :  { %2194 = vmatpush1.bf16.msra.mxu0 %v3624_v45  ;;  %2399 = vmatpush1.bf16.msra.mxu1 %v3627_v46  ;;  %v3719_v45 = vld [vmem:[#allocation2 + $0x8e8] ss:$16 sps:$4 sm:$0xff]   ;;  %v3724_v46 = vld [vmem:[#allocation2 + $0x904] ss:$16 sps:$4 sm:$0xff]  }
 0x12d   :  { %2195 = vmatprep.subr.bf16.mxu0 %v3632_v47  ;;  %2400 = vmatprep.subr.bf16.mxu1 %v3635_v48  ;;  %v3727_v47 = vld [vmem:[#allocation2 + $0x90c] ss:$16 sps:$4 sm:$0xff]   ;;  %v3722_v48 = vld [vmem:[#allocation2 + $0x900] ss:$16 sps:$4 sm:$0xff]  }
 0x130   :  { %2196 = vmatpush1.bf16.msra.mxu0 %v3630_v49  ;;  %2401 = vmatpush1.bf16.msra.mxu1 %v3633_v50  ;;  %v3725_v49 = vld [vmem:[#allocation2 + $0x908] ss:$16 sps:$4 sm:$0xff]   ;;  %v3730_v50 = vld [vmem:[#allocation2 + $0x924] ss:$16 sps:$4 sm:$0xff]  }
 0x131   :  { %2197 = vmatprep.subr.bf16.mxu0 %v3638_v51  ;;  %2402 = vmatprep.subr.bf16.mxu1 %v3641_v52  ;;  %v3733_v51 = vld [vmem:[#allocation2 + $0x92c] ss:$16 sps:$4 sm:$0xff]   ;;  %v3728_v52 = vld [vmem:[#allocation2 + $0x920] ss:$16 sps:$4 sm:$0xff]  }
 0x134   :  { %2198 = vmatpush1.bf16.msra.mxu0 %v3636_v53  ;;  %2403 = vmatpush1.bf16.msra.mxu1 %v3639_v54  ;;  %v3731_v53 = vld [vmem:[#allocation2 + $0x928] ss:$16 sps:$4 sm:$0xff]   ;;  %v3736_v54 = vld [vmem:[#allocation2 + $0x944] ss:$16 sps:$4 sm:$0xff]  }
 0x135   :  { %2199 = vmatprep.subr.bf16.mxu0 %v3644_v55  ;;  %2404 = vmatprep.subr.bf16.mxu1 %v3647_v56  ;;  %v3739_v55 = vld [vmem:[#allocation2 + $0x94c] ss:$16 sps:$4 sm:$0xff]   ;;  %v3734_v56 = vld [vmem:[#allocation2 + $0x940] ss:$16 sps:$4 sm:$0xff]  }
 0x138   :  { %2200 = vmatpush1.bf16.msra.mxu0 %v3642_v57  ;;  %2405 = vmatpush1.bf16.msra.mxu1 %v3645_v58  ;;  %v3737_v57 = vld [vmem:[#allocation2 + $0x948] ss:$16 sps:$4 sm:$0xff]   ;;  %v3742_v58 = vld [vmem:[#allocation2 + $0x964] ss:$16 sps:$4 sm:$0xff]  }
 0x139   :  { %2201 = vmatprep.subr.bf16.mxu0 %v3650_v59  ;;  %2406 = vmatprep.subr.bf16.mxu1 %v3653_v60  ;;  %v3745_v59 = vld [vmem:[#allocation2 + $0x96c] ss:$16 sps:$4 sm:$0xff]   ;;  %v3740_v60 = vld [vmem:[#allocation2 + $0x960] ss:$16 sps:$4 sm:$0xff]  }
 0x13c   :  { %2202 = vmatpush1.bf16.msra.mxu0 %v3648_v61  ;;  %2407 = vmatpush1.bf16.msra.mxu1 %v3651_v62  ;;  %v3743_v61 = vld [vmem:[#allocation2 + $0x968] ss:$16 sps:$4 sm:$0xff]   ;;  %v3748_v62 = vld [vmem:[#allocation2 + $0x984] ss:$16 sps:$4 sm:$0xff]  }
 0x13d   :  { %2203 = vmatprep.subr.bf16.mxu0 %v3656_v63  ;;  %2408 = vmatprep.subr.bf16.mxu1 %v3659_v0  ;;  %v3751_v63 = vld [vmem:[#allocation2 + $0x98c] ss:$16 sps:$4 sm:$0xff]   ;;  %v3746_v0 = vld [vmem:[#allocation2 + $0x980] ss:$16 sps:$4 sm:$0xff]  }
 0x140   :  { %2204 = vmatpush1.bf16.msra.mxu0 %v3654_v1  ;;  %2409 = vmatpush1.bf16.msra.mxu1 %v3657_v2  ;;  %v3749_v1 = vld [vmem:[#allocation2 + $0x988] ss:$16 sps:$4 sm:$0xff]   ;;  %v3754_v2 = vld [vmem:[#allocation2 + $0x9a4] ss:$16 sps:$4 sm:$0xff]  }
 0x141   :  { %2205 = vmatprep.subr.bf16.mxu0 %v3662_v3  ;;  %2410 = vmatprep.subr.bf16.mxu1 %v3665_v4  ;;  %v3757_v3 = vld [vmem:[#allocation2 + $0x9ac] ss:$16 sps:$4 sm:$0xff]   ;;  %v3752_v4 = vld [vmem:[#allocation2 + $0x9a0] ss:$16 sps:$4 sm:$0xff]  }
 0x144   :  { %2206 = vmatpush1.bf16.msra.mxu0 %v3660_v5  ;;  %2411 = vmatpush1.bf16.msra.mxu1 %v3663_v6  ;;  %v3755_v5 = vld [vmem:[#allocation2 + $0x9a8] ss:$16 sps:$4 sm:$0xff]   ;;  %v3760_v6 = vld [vmem:[#allocation2 + $0x9c4] ss:$16 sps:$4 sm:$0xff]  }
 0x145   :  { %2207 = vmatprep.subr.bf16.mxu0 %v3668_v7  ;;  %2412 = vmatprep.subr.bf16.mxu1 %v3671_v8  ;;  %v3763_v7 = vld [vmem:[#allocation2 + $0x9cc] ss:$16 sps:$4 sm:$0xff]   ;;  %v3758_v8 = vld [vmem:[#allocation2 + $0x9c0] ss:$16 sps:$4 sm:$0xff]  }
 0x148   :  { %2208 = vmatpush1.bf16.msra.mxu0 %v3666_v9  ;;  %2413 = vmatpush1.bf16.msra.mxu1 %v3669_v10  ;;  %v3761_v9 = vld [vmem:[#allocation2 + $0x9c8] ss:$16 sps:$4 sm:$0xff]   ;;  %v3766_v10 = vld [vmem:[#allocation2 + $0x9e4] ss:$16 sps:$4 sm:$0xff]  }
 0x149   :  { %2218 = vmatprep.subr.bf16.mxu0 %v3676_v12  ;;  %2423 = vmatprep.subr.bf16.mxu1 %v3679_v13  ;;  %v3769_v12 = vld [vmem:[#allocation2 + $0x9ec] ss:$16 sps:$4 sm:$0xff]   ;;  %v3764_v13 = vld [vmem:[#allocation2 + $0x9e0] ss:$16 sps:$4 sm:$0xff]  }
 0x14b   :  { %2210 = vmatmul.mubr.bf16.vlgmr.msra.gmra.mrb[0].mxu0 %v2837_v15  ;;  %2415 = vmatmul.mubr.bf16.vlgmr.msra.gmra.mrb[0].mxu1 %v2837_v15  ;;  %v3767_v15 = vld [vmem:[#allocation2 + $0x9e8] ss:$16 sps:$4 sm:$0xff]  }
 0x14c   :  { %2219 = vmatpush1.bf16.msra.mxu0 %v3674_v17  ;;  %2424 = vmatpush1.bf16.msra.mxu1 %v3677_v18  ;;  %v3772_v17 = vld [vmem:[#allocation6 + $0x40] sm:$0xff]  }
 0x14d   :  { %2220 = vmatprep.subr.bf16.mxu0 %v3682_v19  ;;  %2425 = vmatprep.subr.bf16.mxu1 %v3685_v11  ;;  %v3773_v18 = vld [vmem:[#allocation6 + $0xc0] sm:$0xff]   ;;  %v2839_v19 = vcombine.low %v4026_v16, %v4026_v16  ;;  %v3782_v16 = vld [vmem:[#allocation6 + $0x10] sm:$0xff]  }
 0x14e   :  { %2250 = vmatprep.mubr.bf16.mxu0 %v2840_v20  ;;  %2455 = vmatprep.mubr.bf16.mxu1 %v2840_v20  ;;  %v3774_v11 = vld [vmem:[#allocation6] sm:$0xff]  }
 0x14f   :  { %v3775_v20 = vld [vmem:[#allocation6 + $0x80] sm:$0xff]  }
 0x150   :  { %2221 = vmatpush1.bf16.msra.mxu0 %v3680_v14  ;;  %2426 = vmatpush1.bf16.msra.mxu1 %v3683_v21  ;;  %v3776_v14 = vld [vmem:[#allocation6 + $0x48] sm:$0xff]  }
 0x151   :  { %2222 = vmatprep.subr.bf16.mxu0 %v3688_v22  ;;  %2427 = vmatprep.subr.bf16.mxu1 %v3691_v23  ;;  %v3777_v21 = vld [vmem:[#allocation6 + $0xc8] sm:$0xff]  }
 0x152   :  { %v3778_v22 = vld [vmem:[#allocation6 + $0x8] sm:$0xff]  }
 0x153   :  { %v3779_v23 = vld [vmem:[#allocation6 + $0x88] sm:$0xff]  }
 0x154   :  { %2223 = vmatpush1.bf16.msra.mxu0 %v3686_v24  ;;  %2428 = vmatpush1.bf16.msra.mxu1 %v3689_v25  ;;  %v3780_v24 = vld [vmem:[#allocation6 + $0x50] sm:$0xff]  }
 0x155   :  { %2224 = vmatprep.subr.bf16.mxu0 %v3694_v26  ;;  %2429 = vmatprep.subr.bf16.mxu1 %v3697_v27  ;;  %v3781_v25 = vld [vmem:[#allocation6 + $0xd0] sm:$0xff]   ;;  %v3784_v27 = vld [vmem:[#allocation6 + $0x58] sm:$0xff]  }
 0x156   :  { %v3783_v26 = vld [vmem:[#allocation6 + $0x90] sm:$0xff]  }
 0x158   :  { %2225 = vmatpush1.bf16.msra.mxu0 %v3692_v28  ;;  %2430 = vmatpush1.bf16.msra.mxu1 %v3695_v29  ;;  %v3785_v28 = vld [vmem:[#allocation6 + $0xd8] sm:$0xff]  }
 0x159   :  { %2226 = vmatprep.subr.bf16.mxu0 %v3700_v30  ;;  %2431 = vmatprep.subr.bf16.mxu1 %v3703_v31  ;;  %v3786_v29 = vld [vmem:[#allocation6 + $0x18] sm:$0xff]   ;;  %v3788_v31 = vld [vmem:[#allocation6 + $0x60] sm:$0xff]  }
 0x15a   :  { %v3787_v30 = vld [vmem:[#allocation6 + $0x98] sm:$0xff]  }
 0x15c   :  { %2227 = vmatpush1.bf16.msra.mxu0 %v3698_v32  ;;  %2432 = vmatpush1.bf16.msra.mxu1 %v3701_v33  ;;  %v3789_v32 = vld [vmem:[#allocation6 + $0xe0] sm:$0xff]  }
 0x15d   :  { %2228 = vmatprep.subr.bf16.mxu0 %v3706_v34  ;;  %2433 = vmatprep.subr.bf16.mxu1 %v3709_v35  ;;  %v3790_v33 = vld [vmem:[#allocation6 + $0x20] sm:$0xff]   ;;  %v3792_v35 = vld [vmem:[#allocation6 + $0x68] sm:$0xff]  }
 0x15e   :  { %v3791_v34 = vld [vmem:[#allocation6 + $0xa0] sm:$0xff]  }
 0x160   :  { %2229 = vmatpush1.bf16.msra.mxu0 %v3704_v36  ;;  %2434 = vmatpush1.bf16.msra.mxu1 %v3707_v37  ;;  %v3793_v36 = vld [vmem:[#allocation6 + $0xe8] sm:$0xff]  }
 0x161   :  { %2230 = vmatprep.subr.bf16.mxu0 %v3712_v38  ;;  %2435 = vmatprep.subr.bf16.mxu1 %v3715_v39  ;;  %v3794_v37 = vld [vmem:[#allocation6 + $0x28] sm:$0xff]   ;;  %v3796_v39 = vld [vmem:[#allocation6 + $0x70] sm:$0xff]  }
 0x162   :  { %v3795_v38 = vld [vmem:[#allocation6 + $0xa8] sm:$0xff]  }
 0x164   :  { %2231 = vmatpush1.bf16.msra.mxu0 %v3710_v40  ;;  %2436 = vmatpush1.bf16.msra.mxu1 %v3713_v41  ;;  %v3797_v40 = vld [vmem:[#allocation6 + $0xf0] sm:$0xff]  }
 0x165   :  { %2232 = vmatprep.subr.bf16.mxu0 %v3718_v42  ;;  %2437 = vmatprep.subr.bf16.mxu1 %v3721_v43  ;;  %v3798_v41 = vld [vmem:[#allocation6 + $0x30] sm:$0xff]   ;;  %v3800_v43 = vld [vmem:[#allocation6 + $0x78] sm:$0xff]  }
 0x166   :  { %v3799_v42 = vld [vmem:[#allocation6 + $0xb0] sm:$0xff]  }
 0x168   :  { %2233 = vmatpush1.bf16.msra.mxu0 %v3716_v44  ;;  %2438 = vmatpush1.bf16.msra.mxu1 %v3719_v45  ;;  %v3801_v44 = vld [vmem:[#allocation6 + $0xf8] sm:$0xff]  }
 0x169   :  { %2234 = vmatprep.subr.bf16.mxu0 %v3724_v46  ;;  %2439 = vmatprep.subr.bf16.mxu1 %v3727_v47  ;;  %v3802_v45 = vld [vmem:[#allocation6 + $0x38] sm:$0xff]   ;;  %v399_v47 = vlaneseq }
 0x16a   :  { %v3803_v46 = vld [vmem:[#allocation6 + $0xb8] sm:$0xff]  }
 0x16c   :  { %2235 = vmatpush1.bf16.msra.mxu0 %v3722_v48  ;;  %2440 = vmatpush1.bf16.msra.mxu1 %v3725_v49  ;;  %v400_v48 = vshrl.u32 %v399_v47, 7 }
 0x16d   :  { %2236 = vmatprep.subr.bf16.mxu0 %v3730_v50  ;;  %2441 = vmatprep.subr.bf16.mxu1 %v3733_v51  ;;  %v397_v51 = vld [vmem:[#allocation4] sm:$0xf] }
 0x16e   :  { %v401_v49 = vsub.s32 0, %v400_v48  ;;  %v409_v50 = vsub.s32 2, %v400_v48 }
 0x170   :  { %2237 = vmatpush1.bf16.msra.mxu0 %v3728_v52  ;;  %2442 = vmatpush1.bf16.msra.mxu1 %v3731_v53  ;;  %v405_v52 = vsub.s32 1, %v400_v48  ;;  %v413_v53 = vsub.s32 3, %v400_v48 }
 0x171   :  { %2238 = vmatprep.subr.bf16.mxu0 %v3736_v54  ;;  %2443 = vmatprep.subr.bf16.mxu1 %v3739_v55  ;;  %v402_v54 = vrot.slane %v397_v51, %v401_v49  ;;  %v410_v55 = vrot.slane %v397_v51, %v409_v50 }
 0x174   :  { %2239 = vmatpush1.bf16.msra.mxu0 %v3734_v56  ;;  %2444 = vmatpush1.bf16.msra.mxu1 %v3737_v57  ;;  %v406_v56 = vrot.slane %v397_v51, %v405_v52  ;;  %v414_v57 = vrot.slane %v397_v51, %v413_v53 }
 0x175   :  { %2240 = vmatprep.subr.bf16.mxu0 %v3742_v58  ;;  %2445 = vmatprep.subr.bf16.mxu1 %v3745_v59 }
 0x178   :  { %2241 = vmatpush1.bf16.msra.mxu0 %v3740_v60  ;;  %2446 = vmatpush1.bf16.msra.mxu1 %v3743_v61 }
 0x179   :  { %2242 = vmatprep.subr.bf16.mxu0 %v3748_v62  ;;  %2447 = vmatprep.subr.bf16.mxu1 %v3751_v63 }
 0x17c   :  { %2243 = vmatpush1.bf16.msra.mxu0 %v3746_v0  ;;  %2448 = vmatpush1.bf16.msra.mxu1 %v3749_v1 }
 0x17d   :  { %2244 = vmatprep.subr.bf16.mxu0 %v3754_v2  ;;  %2449 = vmatprep.subr.bf16.mxu1 %v3757_v3 }
 0x180   :  { %2245 = vmatpush1.bf16.msra.mxu0 %v3752_v4  ;;  %2450 = vmatpush1.bf16.msra.mxu1 %v3755_v5 }
 0x181   :  { %2246 = vmatprep.subr.bf16.mxu0 %v3760_v6  ;;  %2451 = vmatprep.subr.bf16.mxu1 %v3763_v7 }
 0x184   :  { %2247 = vmatpush1.bf16.msra.mxu0 %v3758_v8  ;;  %2452 = vmatpush1.bf16.msra.mxu1 %v3761_v9 }
 0x185   :  { %2248 = vmatprep.subr.bf16.mxu0 %v3766_v10  ;;  %2453 = vmatprep.subr.bf16.mxu1 %v3769_v12 }
 0x188   :  { %2249 = vmatpush1.bf16.msra.mxu0 %v3764_v13  ;;  %2454 = vmatpush1.bf16.msra.mxu1 %v3767_v15 }
 0x189   :  { %3194 = vmatprep.subr.bf16.mxu0 %v3772_v17  ;;  %3216 = vmatprep.subr.bf16.mxu1 %v3773_v18 }
 0x18b   :  { %2251 = vmatmul.mubr.bf16.vlgmr.msra.gmra.mrb[0].mxu0 %v2839_v19  ;;  %2456 = vmatmul.mubr.bf16.vlgmr.msra.gmra.mrb[0].mxu1 %v2839_v19  ;;  %v3161_v19 = vld [vmem:[#allocation7] ss:$0 sm:$0xff] }
 0x18c   :  { %3195 = vmatpush3.bf16.msra.mxu0 %v3774_v11  ;;  %3217 = vmatpush3.bf16.msra.mxu1 %v3775_v20 }
 0x18d   :  { %3196 = vmatprep.subr.bf16.mxu0 %v3776_v14  ;;  %3218 = vmatprep.subr.bf16.mxu1 %v3777_v21 }
 0x190   :  { %3197 = vmatpush3.bf16.msra.mxu0 %v3778_v22  ;;  %3219 = vmatpush3.bf16.msra.mxu1 %v3779_v23 }
 0x191   :  { %3198 = vmatprep.subr.bf16.mxu0 %v3780_v24  ;;  %3220 = vmatprep.subr.bf16.mxu1 %v3781_v25 }
 0x194   :  { %3199 = vmatpush3.bf16.msra.mxu0 %v3782_v16  ;;  %3221 = vmatpush3.bf16.msra.mxu1 %v3783_v26 }
 0x195   :  { %3200 = vmatprep.subr.bf16.mxu0 %v3784_v27  ;;  %3222 = vmatprep.subr.bf16.mxu1 %v3785_v28 }
 0x198   :  { %3201 = vmatpush3.bf16.msra.mxu0 %v3786_v29  ;;  %3223 = vmatpush3.bf16.msra.mxu1 %v3787_v30 }
 0x199   :  { %3202 = vmatprep.subr.bf16.mxu0 %v3788_v31  ;;  %3224 = vmatprep.subr.bf16.mxu1 %v3789_v32 }
 0x19c   :  { %3203 = vmatpush3.bf16.msra.mxu0 %v3790_v33  ;;  %3225 = vmatpush3.bf16.msra.mxu1 %v3791_v34 }
 0x19d   :  { %3204 = vmatprep.subr.bf16.mxu0 %v3792_v35  ;;  %3226 = vmatprep.subr.bf16.mxu1 %v3793_v36 }
 0x1a0   :  { %3205 = vmatpush3.bf16.msra.mxu0 %v3794_v37  ;;  %3227 = vmatpush3.bf16.msra.mxu1 %v3795_v38 }
 0x1a1   :  { %3206 = vmatprep.subr.bf16.mxu0 %v3796_v39  ;;  %3228 = vmatprep.subr.bf16.mxu1 %v3797_v40 }
 0x1a4   :  { %3207 = vmatpush3.bf16.msra.mxu0 %v3798_v41  ;;  %3229 = vmatpush3.bf16.msra.mxu1 %v3799_v42 }
 0x1a5   :  { %3208 = vmatprep.subr.bf16.mxu0 %v3800_v43  ;;  %3230 = vmatprep.subr.bf16.mxu1 %v3801_v44 }
 0x1a8   :  { %3209 = vmatpush3.bf16.msra.mxu0 %v3802_v45  ;;  %3231 = vmatpush3.bf16.msra.mxu1 %v3803_v46 }
 0x25e   :  { %v2252_v58 = vpop.f32.mrb[0].mxu0  ;;  %v2457_v59 = vpop.f32.mrb[0].mxu1 }
 0x25f   :  { %v3238_v60 = vadd.f32 %v2252_v58, %v402_v54  ;;  %v3240_v61 = vadd.f32 %v2457_v59, %v410_v55  ;;  %v2254_v62 = vpop.f32.mrb[1].mxu0  ;;  %v2459_v63 = vpop.f32.mrb[1].mxu1 }
 0x260   :  { %v3239_v0 = vadd.f32 %v2254_v62, %v406_v56  ;;  %v3241_v1 = vadd.f32 %v2459_v63, %v414_v57  ;;  %v2256_v2 = vpop.f32.mrb[2].mxu0  ;;  %v2461_v3 = vpop.f32.mrb[2].mxu1 }
 0x261   :  { %v2464_v4 = vmax.f32 %v3238_v60, 0.0  ;;  %v2466_v5 = vmax.f32 %v3240_v61, 0.0  ;;  %v2257_v6 = vpop.f32.mrb[3].mxu0  ;;  %v2462_v7 = vpop.f32.mrb[3].mxu1 }
 0x262   :  { %v2465_v8 = vmax.f32 %v3239_v0, 0.0  ;;  %v2467_v9 = vmax.f32 %v3241_v1, 0.0 }
 0x263   :  { %v2468_v13 = vpack.c.bf16 %v2464_v4, %v2464_v4  ;;  %v2470_v15 = vpack.c.bf16 %v2466_v5, %v2466_v5 }
 0x264   :  { %v2469_v10 = vpack.c.bf16 %v2465_v8, %v2465_v8  ;;  %v2471_v12 = vpack.c.bf16 %v2467_v9, %v2467_v9 }
 0x266   :  { %2767 = vmatprep.mubr.bf16.mxu0 %v2469_v10  ;;  %2807 = vmatprep.mubr.bf16.mxu1 %v2471_v12 }
 0x267   :  { %2768 = vmatmul.mubr.bf16.vlgmr.msra.gmra.mrb[4].mxu0 %v2468_v13  ;;  %2808 = vmatmul.mubr.bf16.vlgmr.msra.gmra.mrb[4].mxu1 %v2470_v15 }
 0x33a   :  { %v3210_v17 = vpop.f32.mrb[4].mxu0  ;;  %v3232_v18 = vpop.f32.mrb[4].mxu1 }
 0x33b   :  { %v3211_v11 = vpop.f32.mrb[5].mxu0  ;;  %v3233_v20 = vpop.f32.mrb[5].mxu1 }
 0x33c   :  { %v3212_v14 = vadd.f32 %v3211_v11, %v3210_v17  ;;  %v3234_v21 = vadd.f32 %v3233_v20, %v3232_v18  ;;  %v3213_v22 = vpop.f32.mrb[6].mxu0  ;;  %v3235_v23 = vpop.f32.mrb[6].mxu1 }
 0x33d   :  { %v3214_v24 = vpop.f32.mrb[7].mxu0  ;;  %v3236_v25 = vpop.f32.mrb[7].mxu1 }
 0x33e   :  { %v2770_v16 = vadd.f32 %v3212_v14, %v3161_v19 }
 0x340   :  { %v2810_v26 = vadd.f32 %v3234_v21, %v2770_v16 }
 0x342   :  { %v2815_v27 = vmul.f32 %v2810_v26, %v2810_v26 }
 0x344   :  { %v2817_v28 = vsel %vm2816_vm0, %v2815_v27, 0.0 }
 0x345   :  { %2818 = vadd.xlane.f32.xlu0 %v2817_v28 }
 0x3d2   :  { %v2819_v29 = vpop.xlane.xlu0 %2818 }
 0x3d3   :  { %v2820_v30 = vmax.f32 %v2819_v29, 1e-24 }
 0x3d5   :  { %3804 = vrsqrt.f32 %v2820_v30 }
 0x3df   :  { %v3805_v31 = vpop.eup %3804 }
 0x3e0   :  { %v2822_v32 = vmul.f32 %v3805_v31, %v2810_v26 }
 0x3e2   :  { %2823 = vst [vmem:[%s4040_s5] sm:$0x3f] %v2822_v32 }
 0x3e3   :  { %2828 = vsyncpa [#allocation3], 1 }
 0x3e4   :  { %2829 = vsyncpa [#allocation5], 1 }
 0x3e5   :  { %2830 = vsyncpa [#allocation8], 1 }

</bundles_post_ra>
